<compile_context>
chip_gen: v6e
topology: v6e:2x2x1
jax: 0.10.0
libtpu: 0.0.40
codegen_flags: <defaults>
</compile_context>

<pallas_src>
import jax
import jax.numpy as jnp
from jax import lax
from jax.experimental import pallas as pl
from jax.experimental.pallas import tpu as pltpu

LANE = 128
SUBLANE = 8


def _round_up(x, m):
    return ((x + m - 1) // m) * m


def _pad2(x, rows, cols):
    return jnp.pad(x, ((0, rows - x.shape[0]), (0, cols - x.shape[1])))


# ---------------------------------------------------------------------------
# Kernel
# ---------------------------------------------------------------------------
def en_base_kernel(edge_attr_ref, ids_ref, dstrow_ref, h_ref,
                   w1ea_ref, w1ehi_ref, w1ehj_ref, b1e_ref,
                   w2e_ref, b2e_ref, winf_ref, binf_ref,
                   w1na_ref, w1nb_ref, b1n_ref, w2n_ref, b2n_ref,
                   out_ref,
                   mi_ref, pcomb_ref):
    k = pl.program_id(0)
    n_pad = h_ref.shape[0]
    te = edge_attr_ref.shape[0]
    f32 = jnp.float32

    # ---- once, at the first edge tile: fused per-node precompute + accumulator init
    @pl.when(k == 0)
    def _init():
        h = h_ref[...]
        pcomb_ref[pl.ds(0, n_pad), :] = jnp.dot(
            h, w1ehi_ref[...], preferred_element_type=f32)          # P_dst
        pcomb_ref[pl.ds(n_pad, n_pad), :] = jnp.dot(
            h, w1ehj_ref[...], preferred_element_type=f32)          # P_src
        mi_ref[...] = jnp.zeros_like(mi_ref)

    # ---- combined gather one-hot [te, 2*N_pad] (ids on the sublane axis).
    # Padded edges carry dst/src = -1 -> all-zero rows -> masked out.
    ids = ids_ref[...]                      # [te, 2] int32: (dst, src)
    dst_col = ids[:, 0:1]
    src_col = ids[:, 1:2]
    col_iota = lax.broadcasted_iota(jnp.int32, (te, 2 * n_pad), 1)
    sel = jnp.where(col_iota < n_pad, dst_col, src_col + n_pad)
    g_comb = (sel == col_iota).astype(f32)

    # ---- edge_mlp layer 1: streamed edge_attr part + single fused node gather
    z = (jnp.dot(edge_attr_ref[...], w1ea_ref[...], preferred_element_type=f32)
         + jnp.dot(g_comb, pcomb_ref[...], preferred_element_type=f32)
         + b1e_ref[...])
    m = jnp.maximum(z, 0.0)
    # ---- edge_mlp layer 2 (+ ReLU, act_last=True)
    m = jnp.dot(m, w2e_ref[...], preferred_element_type=f32) + b2e_ref[...]
    m = jnp.maximum(m, 0.0)                                  # mij [te, H_pad]

    # ---- edge_inf: sigmoid(<mij, winf> + binf) via VPU mul + lane reduce
    logit = jnp.sum(m * winf_ref[...], axis=-1, keepdims=True) + binf_ref[...]
    me = m * jax.nn.sigmoid(logit)                           # gated messages

    # ---- scatter_sum over dst: transposed one-hot built directly (no XLU
    # transpose) from the lane-dense dst row; plain jnp.dot onto the MXU.
    dst_row = dstrow_ref[0]                                  # [1, te] int32
    sub_iota = lax.broadcasted_iota(jnp.int32, (n_pad, te), 0)
    g_dst_t = (dst_row == sub_iota).astype(f32)              # [N_pad, te]
    mi_ref[...] += jnp.dot(g_dst_t, me, preferred_element_type=f32)

    # ---- once, at the last tile: node_mlp on concat([mi, h]) (split weights)
    @pl.when(k == pl.num_programs(0) - 1)
    def _finalize():
        y = (jnp.dot(mi_ref[...], w1na_ref[...], preferred_element_type=f32)
             + jnp.dot(h_ref[...], w1nb_ref[...], preferred_element_type=f32)
             + b1n_ref[...])
        y = jnp.maximum(y, 0.0)
        out_ref[...] = (jnp.dot(y, w2n_ref[...], preferred_element_type=f32)
                        + b2n_ref[...])


# ---------------------------------------------------------------------------
# Parameter prep (pad / split ONCE, not per call)
# ---------------------------------------------------------------------------
def prepare_params(params, hidden_dim, edge_in_feat_dim):
    H, Fe = hidden_dim, edge_in_feat_dim
    Hp = _round_up(H, LANE)
    w1e = params["w1e"]                      # [Fe + 2H, H], concat order [attr, hi, hj]
    return {
        # attr part kept with unpadded contraction dim (K = Fe)
        "w1e_attr": jnp.pad(w1e[:Fe], ((0, 0), (0, Hp - H))),
        "w1e_hi":   _pad2(w1e[Fe:Fe + H], Hp, Hp),
        "w1e_hj":   _pad2(w1e[Fe + H:], Hp, Hp),
        "b1e":      _pad2(params["b1e"], 1, Hp),
        "w2e":      _pad2(params["w2e"], Hp, Hp),
        "b2e":      _pad2(params["b2e"], 1, Hp),
        "winf_row": _pad2(params["winf"].T, 1, Hp),
        "binf":     params["binf"].reshape(1, 1),
        "w1n_mi":   _pad2(params["w1n"][:H], Hp, Hp),
        "w1n_h":    _pad2(params["w1n"][H:], Hp, Hp),
        "b1n":      _pad2(params["b1n"], 1, Hp),
        "w2n":      _pad2(params["w2n"], Hp, Hp),
        "b2n":      _pad2(params["b2n"], 1, Hp),
    }


# ---------------------------------------------------------------------------
# VMEM footprint estimate (resident + double-buffered streams + live temps)
# ---------------------------------------------------------------------------
def _vmem_bytes_estimate(Np, Hp, Fe, tile_e):
    lane = lambda c: _round_up(c, LANE)
    b = 4
    resident = b * (
        2 * Np * Hp                       # h (resident input) + out
        + 3 * Np * Hp                     # mi scratch + stacked P_comb (2*Np)
        + _round_up(Fe, SUBLANE) * Hp     # w1e_attr
        + 6 * Hp * Hp                     # w1e_hi/hj, w2e, w1n_mi/h, w2n
        + 6 * SUBLANE * Hp)               # biases / winf / binf (sublane padded)
    streamed = 2 * b * (                  # default Buffered(2)
        tile_e * lane(Fe)                 # edge_attr (lane-padded in VMEM)
        + tile_e * LANE                   # packed (dst, src) column ids
        + SUBLANE * tile_e)               # lane-dense dst row
    live = b * (
        tile_e * lane(2 * Np)             # combined gather one-hot
        + Np * tile_e                     # transposed scatter one-hot
        + 4 * tile_e * Hp)                # z / m / me temporaries (rough)
    return resident + streamed + live


# ---------------------------------------------------------------------------
# Wrapper
# ---------------------------------------------------------------------------
def en_base_layer_pallas(h, edge_index, edge_attr, prepped, *, tile_e=None):
    N, H = h.shape
    E, Fe = edge_attr.shape
    Hp = _round_up(H, LANE)
    Np = _round_up(N, SUBLANE)
    if tile_e is None:
        # balanced tiles (<=1024 edges each), rounded to the lane width:
        # minimizes ghost-edge padding (e.g. E=1100 -> 2x640 instead of 2x1024)
        n_tiles = max(1, -(-E // 1024))
        tile_e = _round_up(-(-E // n_tiles), LANE)
    Ep = _round_up(max(E, 1), tile_e)
    grid_e = Ep // tile_e

    dst = edge_index[0].astype(jnp.int32)
    src = edge_index[1].astype(jnp.int32)
    # sentinel -1 for padded edges -> zero one-hot rows/cols (required masking)
    ids_col = jnp.pad(jnp.stack([dst, src], axis=1),
                      ((0, Ep - E), (0, 0)), constant_values=-1)      # [Ep, 2]
    dst_row = jnp.pad(dst, (0, Ep - E),
                      constant_values=-1).reshape(grid_e, 1, tile_e)  # lane-dense
    edge_attr_p = jnp.pad(edge_attr.astype(jnp.float32),
                          ((0, Ep - E), (0, 0)))                      # [Ep, Fe]
    h_p = _pad2(h.astype(jnp.float32), Np, Hp)

    inputs = (
        edge_attr_p, ids_col, dst_row, h_p,
        prepped["w1e_attr"], prepped["w1e_hi"], prepped["w1e_hj"], prepped["b1e"],
        prepped["w2e"], prepped["b2e"], prepped["winf_row"], prepped["binf"],
        prepped["w1n_mi"], prepped["w1n_h"], prepped["b1n"], prepped["w2n"],
        prepped["b2n"],
    )

    tile_map2 = lambda k: (k, 0)
    tile_map3 = lambda k: (k, 0, 0)
    full_map = lambda k: (0, 0)
    in_specs = [
        pl.BlockSpec((tile_e, Fe), tile_map2),       # edge_attr (unpadded lanes)
        pl.BlockSpec((tile_e, 2), tile_map2),        # packed (dst, src) columns
        pl.BlockSpec((1, 1, tile_e), tile_map3),     # lane-dense dst row
    ] + [pl.BlockSpec(x.shape, full_map) for x in inputs[3:]]  # resident h + weights

    # VMEM budget: computed requirement + headroom, capped at 64 MiB (v7x).
    est = _vmem_bytes_estimate(Np, Hp, Fe, tile_e)
    assert est <= 48 * 1024 * 1024, (
        f"VMEM estimate {est/2**20:.1f} MiB exceeds the v7x budget; "
        "shrink tile_e or tile the node axis")
    vmem_limit = int(min(max(est + (16 << 20), 24 << 20), 64 << 20))

    flops = 2 * (2 * Np * Hp * Hp            # per-node precompute h @ W1e_{hi,hj}
                 + Ep * Fe * Hp              # edge_attr part of layer 1
                 + Ep * (2 * Np) * Hp        # fused one-hot gather
                 + Ep * Hp * Hp              # edge_mlp layer 2
                 + Ep * Np * Hp              # scatter_sum
                 + 3 * Np * Hp * Hp)         # node_mlp
    bytes_accessed = sum(int(x.size) * 4 for x in inputs) + Np * Hp * 4

    out = pl.pallas_call(
        en_base_kernel,
        out_shape=jax.ShapeDtypeStruct((Np, Hp), jnp.float32),
        grid_spec=pltpu.PrefetchScalarGridSpec(
            num_scalar_prefetch=0,
            grid=(grid_e,),
            in_specs=in_specs,
            out_specs=pl.BlockSpec((Np, Hp), full_map),
            scratch_shapes=[pltpu.VMEM((Np, Hp), jnp.float32),       # mi accumulator
                            pltpu.VMEM((2 * Np, Hp), jnp.float32)],  # stacked P_dst/P_src
        ),
        compiler_params=pltpu.CompilerParams(
            dimension_semantics=("arbitrary",),      # E axis carries the accumulator
            vmem_limit_bytes=vmem_limit,
        ),
        cost_estimate=pl.CostEstimate(flops=flops, transcendentals=Ep,
                                      bytes_accessed=bytes_accessed),
    )(*inputs)
    return out[:N, :H]


# ---------------------------------------------------------------------------
# Pure-JAX reference (matches the PyTorch forward)
# ---------------------------------------------------------------------------
def en_base_layer_ref(h, edge_index, edge_attr, params):
    N, H = h.shape
    dst, src = edge_index[0], edge_index[1]
    hi, hj = h[dst], h[src]
    x = jnp.concatenate([edge_attr, hi, hj], axis=-1)
    m = jax.nn.relu(x @ params["w1e"] + params["b1e"])
    m = jax.nn.relu(m @ params["w2e"] + params["b2e"])
    e = jax.nn.sigmoid(m @ params["winf"] + params["binf"])
    mi = jax.ops.segment_sum(m * e, dst, num_segments=N)
    nx = jnp.concatenate([mi, h], axis=-1)
    y = jax.nn.relu(nx @ params["w1n"] + params["b1n"])
    return y @ params["w2n"] + params["b2n"]


def init_params(key, hidden_dim, edge_feat_dim, num_r_gaussian):
    """Deterministic synthetic init (shapes follow EnBaseLayer.__init__)."""
    in_dim = 2 * hidden_dim + edge_feat_dim + num_r_gaussian
    keys = jax.random.split(key, 7)
    s = 0.2
    return {
        # edge_mlp: Linear(in_dim, H) -> ReLU -> Linear(H, H) -> ReLU
        "w1e": jax.random.normal(keys[0], (in_dim, hidden_dim), jnp.float32) * s,
        "b1e": jnp.zeros((1, hidden_dim), jnp.float32),
        "w2e": jax.random.normal(keys[1], (hidden_dim, hidden_dim), jnp.float32) * s,
        "b2e": jax.random.normal(keys[2], (1, hidden_dim), jnp.float32) * s,
        # edge_inf: Linear(H, 1) -> Sigmoid
        "winf": jax.random.normal(keys[3], (hidden_dim, 1), jnp.float32) * s,
        "binf": jnp.zeros((1, 1), jnp.float32),
        # node_mlp: Linear(2H, H) -> ReLU -> Linear(H, H)
        "w1n": jax.random.normal(keys[4], (2 * hidden_dim, hidden_dim), jnp.float32) * s,
        "b1n": jax.random.normal(keys[5], (1, hidden_dim), jnp.float32) * s,
        "w2n": jax.random.normal(keys[6], (hidden_dim, hidden_dim), jnp.float32) * s,
        "b2n": jnp.zeros((1, hidden_dim), jnp.float32),
    }


if __name__ == "__main__":
    hidden_dim = 32
    edge_feat_dim = 4
    num_r_gaussian = 8
    N = 16   # nodes
    E = 37   # edges (non-multiple of the tile -> exercises padding/masking)

    key = jax.random.PRNGKey(0)
    k_h, k_attr, k_dst, k_src, k_p = jax.random.split(key, 5)

    h = jax.random.normal(k_h, (N, hidden_dim), jnp.float32)
    edge_attr = jax.random.normal(
        k_attr, (E, edge_feat_dim + num_r_gaussian), jnp.float32)
    dst = jax.random.randint(k_dst, (E,), 0, N, jnp.int32)
    src = jax.random.randint(k_src, (E,), 0, N, jnp.int32)
    edge_index = jnp.stack([dst, src], axis=0)

    params = init_params(k_p, hidden_dim, edge_feat_dim, num_r_gaussian)
    prepped = prepare_params(params, hidden_dim, edge_feat_dim + num_r_gaussian)

    out = en_base_layer_pallas(h, edge_index, edge_attr, prepped)
    out = jax.block_until_ready(out)

    ref = en_base_layer_ref(h, edge_index, edge_attr, params)
    assert out.shape == (N, hidden_dim)
    assert jnp.allclose(out, ref, atol=1e-4, rtol=1e-4), "mismatch vs reference"

    print("KERNEL_OK")
</pallas_src>

<mosaic_0001>
module attributes {stable_mosaic.version = 11 : i64} {
  func.func @en_base_kernel(%arg0: i32, %arg1: memref<128x12xf32, #tpu.memory_space<vmem>>, %arg2: memref<128x2xi32, #tpu.memory_space<vmem>>, %arg3: memref<1x1x128xi32, #tpu.memory_space<vmem>>, %arg4: memref<16x128xf32, #tpu.memory_space<vmem>>, %arg5: memref<12x128xf32, #tpu.memory_space<vmem>>, %arg6: memref<128x128xf32, #tpu.memory_space<vmem>>, %arg7: memref<128x128xf32, #tpu.memory_space<vmem>>, %arg8: memref<1x128xf32, #tpu.memory_space<vmem>>, %arg9: memref<128x128xf32, #tpu.memory_space<vmem>>, %arg10: memref<1x128xf32, #tpu.memory_space<vmem>>, %arg11: memref<1x128xf32, #tpu.memory_space<vmem>>, %arg12: memref<1x1xf32, #tpu.memory_space<vmem>>, %arg13: memref<128x128xf32, #tpu.memory_space<vmem>>, %arg14: memref<128x128xf32, #tpu.memory_space<vmem>>, %arg15: memref<1x128xf32, #tpu.memory_space<vmem>>, %arg16: memref<128x128xf32, #tpu.memory_space<vmem>>, %arg17: memref<1x128xf32, #tpu.memory_space<vmem>>, %arg18: memref<16x128xf32, #tpu.memory_space<vmem>>, %arg19: memref<16x128xf32, #tpu.memory_space<vmem>>, %arg20: memref<32x128xf32, #tpu.memory_space<vmem>>) attributes {dimension_semantics = [#tpu.dimension_semantics<arbitrary>], iteration_bounds = array<i64: 1>, scalar_prefetch = 0 : i64, scratch_operands = 2 : i64, tpu.core_type = #tpu.core_type<tc>, window_params = [{transform_indices = @transform_0, window_bounds = array<i64: 128, 12>}, {transform_indices = @transform_1, window_bounds = array<i64: 128, 2>}, {transform_indices = @transform_2, window_bounds = array<i64: 1, 1, 128>}, {pipeline_mode = #tpu.pipeline_mode<synchronous>, transform_indices = @transform_3, window_bounds = array<i64: 16, 128>}, {pipeline_mode = #tpu.pipeline_mode<synchronous>, transform_indices = @transform_4, window_bounds = array<i64: 12, 128>}, {pipeline_mode = #tpu.pipeline_mode<synchronous>, transform_indices = @transform_5, window_bounds = array<i64: 128, 128>}, {pipeline_mode = #tpu.pipeline_mode<synchronous>, transform_indices = @transform_6, window_bounds = array<i64: 128, 128>}, {pipeline_mode = #tpu.pipeline_mode<synchronous>, transform_indices = @transform_7, window_bounds = array<i64: 1, 128>}, {pipeline_mode = #tpu.pipeline_mode<synchronous>, transform_indices = @transform_8, window_bounds = array<i64: 128, 128>}, {pipeline_mode = #tpu.pipeline_mode<synchronous>, transform_indices = @transform_9, window_bounds = array<i64: 1, 128>}, {pipeline_mode = #tpu.pipeline_mode<synchronous>, transform_indices = @transform_10, window_bounds = array<i64: 1, 128>}, {pipeline_mode = #tpu.pipeline_mode<synchronous>, transform_indices = @transform_11, window_bounds = array<i64: 1, 1>}, {pipeline_mode = #tpu.pipeline_mode<synchronous>, transform_indices = @transform_12, window_bounds = array<i64: 128, 128>}, {pipeline_mode = #tpu.pipeline_mode<synchronous>, transform_indices = @transform_13, window_bounds = array<i64: 128, 128>}, {pipeline_mode = #tpu.pipeline_mode<synchronous>, transform_indices = @transform_14, window_bounds = array<i64: 1, 128>}, {pipeline_mode = #tpu.pipeline_mode<synchronous>, transform_indices = @transform_15, window_bounds = array<i64: 128, 128>}, {pipeline_mode = #tpu.pipeline_mode<synchronous>, transform_indices = @transform_16, window_bounds = array<i64: 1, 128>}, {pipeline_mode = #tpu.pipeline_mode<synchronous>, transform_indices = @transform_17, window_bounds = array<i64: 16, 128>}]} {
    %c0_i32 = arith.constant 0 : i32
    %0 = arith.cmpi eq, %arg0, %c0_i32 : i32
    %1 = arith.extui %0 : i1 to i32
    %c0_i32_0 = arith.constant 0 : i32
    %2 = arith.cmpi ne, %1, %c0_i32_0 : i32
    scf.if %2 {
      %c0_35 = arith.constant 0 : index
      %c0_36 = arith.constant 0 : index
      %66 = vector.load %arg4[%c0_35, %c0_36] : memref<16x128xf32, #tpu.memory_space<vmem>>, vector<16x128xf32>
      %c0_37 = arith.constant 0 : index
      %c0_38 = arith.constant 0 : index
      %67 = vector.load %arg6[%c0_37, %c0_38] : memref<128x128xf32, #tpu.memory_space<vmem>>, vector<128x128xf32>
      %cst_39 = arith.constant dense<0.000000e+00> : vector<16x128xf32>
      %68 = tpu.matmul %66, %67, %cst_39 {dimension_numbers = #tpu.dot_dimension_numbers<[1], [0], [0], [1], [0, 0, 1, 1], [], []>} : vector<16x128xf32>, vector<128x128xf32>, vector<16x128xf32> -> vector<16x128xf32>
      %c0_40 = arith.constant 0 : index
      %c0_41 = arith.constant 0 : index
      %69 = vector.load %arg20[%c0_40, %c0_41] : memref<32x128xf32, #tpu.memory_space<vmem>>, vector<16x128xf32>
      tpu.vector_store %arg20[%c0_40, %c0_41], %68 {strides = array<i32>} : memref<32x128xf32, #tpu.memory_space<vmem>>, vector<16x128xf32>,
      %c0_42 = arith.constant 0 : index
      %c0_43 = arith.constant 0 : index
      %70 = vector.load %arg7[%c0_42, %c0_43] : memref<128x128xf32, #tpu.memory_space<vmem>>, vector<128x128xf32>
      %cst_44 = arith.constant dense<0.000000e+00> : vector<16x128xf32>
      %71 = tpu.matmul %66, %70, %cst_44 {dimension_numbers = #tpu.dot_dimension_numbers<[1], [0], [0], [1], [0, 0, 1, 1], [], []>} : vector<16x128xf32>, vector<128x128xf32>, vector<16x128xf32> -> vector<16x128xf32>
      %c16 = arith.constant 16 : index
      %c0_45 = arith.constant 0 : index
      %72 = vector.load %arg20[%c16, %c0_45] : memref<32x128xf32, #tpu.memory_space<vmem>>, vector<16x128xf32>
      tpu.vector_store %arg20[%c16, %c0_45], %71 {strides = array<i32>} : memref<32x128xf32, #tpu.memory_space<vmem>>, vector<16x128xf32>,
      %cst_46 = arith.constant 0.000000e+00 : f32
      %73 = vector.broadcast %cst_46 : f32 to vector<16x128xf32>
      %c0_47 = arith.constant 0 : index
      %c0_48 = arith.constant 0 : index
      %74 = vector.load %arg19[%c0_47, %c0_48] : memref<16x128xf32, #tpu.memory_space<vmem>>, vector<16x128xf32>
      tpu.vector_store %arg19[%c0_47, %c0_48], %73 {strides = array<i32>} : memref<16x128xf32, #tpu.memory_space<vmem>>, vector<16x128xf32>,
    } else {
    }
    %c0 = arith.constant 0 : index
    %c0_1 = arith.constant 0 : index
    %3 = vector.load %arg2[%c0, %c0_1] : memref<128x2xi32, #tpu.memory_space<vmem>>, vector<128x2xi32>
    %4 = vector.extract_strided_slice %3 {offsets = [0, 0], sizes = [128, 1], strides = [1, 1]} : vector<128x2xi32> to vector<128x1xi32>
    %5 = vector.extract_strided_slice %3 {offsets = [0, 1], sizes = [128, 1], strides = [1, 1]} : vector<128x2xi32> to vector<128x1xi32>
    %6 = tpu.iota {dimensions = array<i32: 1>} : vector<128x32xi32>
    %c16_i32 = arith.constant 16 : i32
    %7 = vector.broadcast %c16_i32 : i32 to vector<128x32xi32>
    %8 = arith.cmpi slt, %6, %7 : vector<128x32xi32>
    %c16_i32_2 = arith.constant 16 : i32
    %9 = vector.broadcast %c16_i32_2 : i32 to vector<128x1xi32>
    %10 = arith.addi %5, %9 : vector<128x1xi32>
    %11 = vector.shape_cast %4 : vector<128x1xi32> to vector<128x1xi32>
    %12 = vector.broadcast %11 : vector<128x1xi32> to vector<128x32xi32>
    %13 = vector.shape_cast %10 : vector<128x1xi32> to vector<128x1xi32>
    %14 = vector.broadcast %13 : vector<128x1xi32> to vector<128x32xi32>
    %15 = arith.select %8, %12, %14 : vector<128x32xi1>, vector<128x32xi32>
    %16 = arith.cmpi eq, %15, %6 : vector<128x32xi32>
    %17 = arith.extui %16 : vector<128x32xi1> to vector<128x32xi32>
    %18 = arith.sitofp %17 : vector<128x32xi32> to vector<128x32xf32>
    %c0_3 = arith.constant 0 : index
    %c0_4 = arith.constant 0 : index
    %19 = vector.load %arg1[%c0_3, %c0_4] : memref<128x12xf32, #tpu.memory_space<vmem>>, vector<128x12xf32>
    %c0_5 = arith.constant 0 : index
    %c0_6 = arith.constant 0 : index
    %20 = vector.load %arg5[%c0_5, %c0_6] : memref<12x128xf32, #tpu.memory_space<vmem>>, vector<12x128xf32>
    %cst = arith.constant dense<0.000000e+00> : vector<128x128xf32>
    %21 = tpu.matmul %19, %20, %cst {dimension_numbers = #tpu.dot_dimension_numbers<[1], [0], [0], [1], [0, 0, 1, 1], [], []>} : vector<128x12xf32>, vector<12x128xf32>, vector<128x128xf32> -> vector<128x128xf32>
    %c0_7 = arith.constant 0 : index
    %c0_8 = arith.constant 0 : index
    %22 = vector.load %arg20[%c0_7, %c0_8] : memref<32x128xf32, #tpu.memory_space<vmem>>, vector<32x128xf32>
    %cst_9 = arith.constant dense<0.000000e+00> : vector<128x128xf32>
    %23 = tpu.matmul %18, %22, %cst_9 {dimension_numbers = #tpu.dot_dimension_numbers<[1], [0], [0], [1], [0, 0, 1, 1], [], []>} : vector<128x32xf32>, vector<32x128xf32>, vector<128x128xf32> -> vector<128x128xf32>
    %24 = arith.addf %21, %23 : vector<128x128xf32>
    %c0_10 = arith.constant 0 : index
    %c0_11 = arith.constant 0 : index
    %25 = vector.load %arg8[%c0_10, %c0_11] : memref<1x128xf32, #tpu.memory_space<vmem>>, vector<1x128xf32>
    %26 = vector.broadcast %25 : vector<1x128xf32> to vector<128x128xf32>
    %27 = arith.addf %24, %26 : vector<128x128xf32>
    %cst_12 = arith.constant 0.000000e+00 : f32
    %28 = vector.broadcast %cst_12 : f32 to vector<128x128xf32>
    %29 = arith.maximumf %27, %28 : vector<128x128xf32>
    %c0_13 = arith.constant 0 : index
    %c0_14 = arith.constant 0 : index
    %30 = vector.load %arg9[%c0_13, %c0_14] : memref<128x128xf32, #tpu.memory_space<vmem>>, vector<128x128xf32>
    %cst_15 = arith.constant dense<0.000000e+00> : vector<128x128xf32>
    %31 = tpu.matmul %29, %30, %cst_15 {dimension_numbers = #tpu.dot_dimension_numbers<[1], [0], [0], [1], [0, 0, 1, 1], [], []>} : vector<128x128xf32>, vector<128x128xf32>, vector<128x128xf32> -> vector<128x128xf32>
    %c0_16 = arith.constant 0 : index
    %c0_17 = arith.constant 0 : index
    %32 = vector.load %arg10[%c0_16, %c0_17] : memref<1x128xf32, #tpu.memory_space<vmem>>, vector<1x128xf32>
    %33 = vector.broadcast %32 : vector<1x128xf32> to vector<128x128xf32>
    %34 = arith.addf %31, %33 : vector<128x128xf32>
    %cst_18 = arith.constant 0.000000e+00 : f32
    %35 = vector.broadcast %cst_18 : f32 to vector<128x128xf32>
    %36 = arith.maximumf %34, %35 : vector<128x128xf32>
    %c0_19 = arith.constant 0 : index
    %c0_20 = arith.constant 0 : index
    %37 = vector.load %arg11[%c0_19, %c0_20] : memref<1x128xf32, #tpu.memory_space<vmem>>, vector<1x128xf32>
    %38 = vector.broadcast %37 : vector<1x128xf32> to vector<128x128xf32>
    %39 = arith.mulf %36, %38 : vector<128x128xf32>
    %cst_21 = arith.constant dense<0.000000e+00> : vector<128xf32>
    %40 = vector.multi_reduction <add>, %39, %cst_21 [1] : vector<128x128xf32> to vector<128xf32>
    %41 = vector.shape_cast %40 : vector<128xf32> to vector<128x1xf32>
    %c0_22 = arith.constant 0 : index
    %c0_23 = arith.constant 0 : index
    %42 = vector.load %arg12[%c0_22, %c0_23] : memref<1x1xf32, #tpu.memory_space<vmem>>, vector<1x1xf32>
    %43 = vector.broadcast %42 : vector<1x1xf32> to vector<128x1xf32>
    %44 = arith.addf %41, %43 : vector<128x1xf32>
    %45 = arith.negf %44 : vector<128x1xf32>
    %46 = math.exp %45 : vector<128x1xf32>
    %cst_24 = arith.constant 1.000000e+00 : f32
    %47 = vector.broadcast %cst_24 : f32 to vector<128x1xf32>
    %48 = arith.addf %47, %46 : vector<128x1xf32>
    %49 = arith.divf %47, %48 : vector<128x1xf32>
    %50 = vector.broadcast %49 : vector<128x1xf32> to vector<128x128xf32>
    %51 = arith.mulf %36, %50 : vector<128x128xf32>
    %c0_25 = arith.constant 0 : index
    %c0_26 = arith.constant 0 : index
    %c0_27 = arith.constant 0 : index
    %52 = vector.load %arg3[%c0_25, %c0_26, %c0_27] : memref<1x1x128xi32, #tpu.memory_space<vmem>>, vector<1x1x128xi32>
    %53 = vector.shape_cast %52 : vector<1x1x128xi32> to vector<1x128xi32>
    %54 = tpu.iota {dimensions = array<i32: 0>} : vector<16x128xi32>
    %55 = vector.broadcast %53 : vector<1x128xi32> to vector<16x128xi32>
    %56 = arith.cmpi eq, %55, %54 : vector<16x128xi32>
    %57 = arith.extui %56 : vector<16x128xi1> to vector<16x128xi32>
    %58 = arith.sitofp %57 : vector<16x128xi32> to vector<16x128xf32>
    %c0_28 = arith.constant 0 : index
    %c0_29 = arith.constant 0 : index
    %59 = vector.load %arg19[%c0_28, %c0_29] : memref<16x128xf32, #tpu.memory_space<vmem>>, vector<16x128xf32>
    %cst_30 = arith.constant dense<0.000000e+00> : vector<16x128xf32>
    %60 = tpu.matmul %58, %51, %cst_30 {dimension_numbers = #tpu.dot_dimension_numbers<[1], [0], [0], [1], [0, 0, 1, 1], [], []>} : vector<16x128xf32>, vector<128x128xf32>, vector<16x128xf32> -> vector<16x128xf32>
    %61 = arith.addf %59, %60 : vector<16x128xf32>
    %c0_31 = arith.constant 0 : index
    %c0_32 = arith.constant 0 : index
    %62 = vector.load %arg19[%c0_31, %c0_32] : memref<16x128xf32, #tpu.memory_space<vmem>>, vector<16x128xf32>
    tpu.vector_store %arg19[%c0_31, %c0_32], %61 {strides = array<i32>} : memref<16x128xf32, #tpu.memory_space<vmem>>, vector<16x128xf32>,
    %c0_i32_33 = arith.constant 0 : i32
    %63 = arith.cmpi eq, %arg0, %c0_i32_33 : i32
    %64 = arith.extui %63 : i1 to i32
    %c0_i32_34 = arith.constant 0 : i32
    %65 = arith.cmpi ne, %64, %c0_i32_34 : i32
    scf.if %65 {
      %c0_35 = arith.constant 0 : index
      %c0_36 = arith.constant 0 : index
      %66 = vector.load %arg19[%c0_35, %c0_36] : memref<16x128xf32, #tpu.memory_space<vmem>>, vector<16x128xf32>
      %c0_37 = arith.constant 0 : index
      %c0_38 = arith.constant 0 : index
      %67 = vector.load %arg13[%c0_37, %c0_38] : memref<128x128xf32, #tpu.memory_space<vmem>>, vector<128x128xf32>
      %cst_39 = arith.constant dense<0.000000e+00> : vector<16x128xf32>
      %68 = tpu.matmul %66, %67, %cst_39 {dimension_numbers = #tpu.dot_dimension_numbers<[1], [0], [0], [1], [0, 0, 1, 1], [], []>} : vector<16x128xf32>, vector<128x128xf32>, vector<16x128xf32> -> vector<16x128xf32>
      %c0_40 = arith.constant 0 : index
      %c0_41 = arith.constant 0 : index
      %69 = vector.load %arg4[%c0_40, %c0_41] : memref<16x128xf32, #tpu.memory_space<vmem>>, vector<16x128xf32>
      %c0_42 = arith.constant 0 : index
      %c0_43 = arith.constant 0 : index
      %70 = vector.load %arg14[%c0_42, %c0_43] : memref<128x128xf32, #tpu.memory_space<vmem>>, vector<128x128xf32>
      %cst_44 = arith.constant dense<0.000000e+00> : vector<16x128xf32>
      %71 = tpu.matmul %69, %70, %cst_44 {dimension_numbers = #tpu.dot_dimension_numbers<[1], [0], [0], [1], [0, 0, 1, 1], [], []>} : vector<16x128xf32>, vector<128x128xf32>, vector<16x128xf32> -> vector<16x128xf32>
      %72 = arith.addf %68, %71 : vector<16x128xf32>
      %c0_45 = arith.constant 0 : index
      %c0_46 = arith.constant 0 : index
      %73 = vector.load %arg15[%c0_45, %c0_46] : memref<1x128xf32, #tpu.memory_space<vmem>>, vector<1x128xf32>
      %74 = vector.broadcast %73 : vector<1x128xf32> to vector<16x128xf32>
      %75 = arith.addf %72, %74 : vector<16x128xf32>
      %cst_47 = arith.constant 0.000000e+00 : f32
      %76 = vector.broadcast %cst_47 : f32 to vector<16x128xf32>
      %77 = arith.maximumf %75, %76 : vector<16x128xf32>
      %c0_48 = arith.constant 0 : index
      %c0_49 = arith.constant 0 : index
      %78 = vector.load %arg16[%c0_48, %c0_49] : memref<128x128xf32, #tpu.memory_space<vmem>>, vector<128x128xf32>
      %cst_50 = arith.constant dense<0.000000e+00> : vector<16x128xf32>
      %79 = tpu.matmul %77, %78, %cst_50 {dimension_numbers = #tpu.dot_dimension_numbers<[1], [0], [0], [1], [0, 0, 1, 1], [], []>} : vector<16x128xf32>, vector<128x128xf32>, vector<16x128xf32> -> vector<16x128xf32>
      %c0_51 = arith.constant 0 : index
      %c0_52 = arith.constant 0 : index
      %80 = vector.load %arg17[%c0_51, %c0_52] : memref<1x128xf32, #tpu.memory_space<vmem>>, vector<1x128xf32>
      %81 = vector.broadcast %80 : vector<1x128xf32> to vector<16x128xf32>
      %82 = arith.addf %79, %81 : vector<16x128xf32>
      %c0_53 = arith.constant 0 : index
      %c0_54 = arith.constant 0 : index
      %83 = vector.load %arg18[%c0_53, %c0_54] : memref<16x128xf32, #tpu.memory_space<vmem>>, vector<16x128xf32>
      tpu.vector_store %arg18[%c0_53, %c0_54], %82 {strides = array<i32>} : memref<16x128xf32, #tpu.memory_space<vmem>>, vector<16x128xf32>,
    } else {
    }
    return
  }
  func.func @transform_0(%arg0: i32) -> (i32, i32) {
    %c0_i32 = arith.constant 0 : i32
    %c0_i32_0 = arith.constant 0 : i32
    return %arg0, %c0_i32 : i32, i32
  }
  func.func @transform_1(%arg0: i32) -> (i32, i32) {
    %c0_i32 = arith.constant 0 : i32
    %c0_i32_0 = arith.constant 0 : i32
    return %arg0, %c0_i32 : i32, i32
  }
  func.func @transform_2(%arg0: i32) -> (i32, i32, i32) {
    %c0_i32 = arith.constant 0 : i32
    %c0_i32_0 = arith.constant 0 : i32
    %c0_i32_1 = arith.constant 0 : i32
    return %arg0, %c0_i32, %c0_i32_0 : i32, i32, i32
  }
  func.func @transform_3(%arg0: i32) -> (i32, i32) {
    %c0_i32 = arith.constant 0 : i32
    %c0_i32_0 = arith.constant 0 : i32
    %c0_i32_1 = arith.constant 0 : i32
    return %c0_i32, %c0_i32_0 : i32, i32
  }
  func.func @transform_4(%arg0: i32) -> (i32, i32) {
    %c0_i32 = arith.constant 0 : i32
    %c0_i32_0 = arith.constant 0 : i32
    %c0_i32_1 = arith.constant 0 : i32
    return %c0_i32, %c0_i32_0 : i32, i32
  }
  func.func @transform_5(%arg0: i32) -> (i32, i32) {
    %c0_i32 = arith.constant 0 : i32
    %c0_i32_0 = arith.constant 0 : i32
    %c0_i32_1 = arith.constant 0 : i32
    return %c0_i32, %c0_i32_0 : i32, i32
  }
  func.func @transform_6(%arg0: i32) -> (i32, i32) {
    %c0_i32 = arith.constant 0 : i32
    %c0_i32_0 = arith.constant 0 : i32
    %c0_i32_1 = arith.constant 0 : i32
    return %c0_i32, %c0_i32_0 : i32, i32
  }
  func.func @transform_7(%arg0: i32) -> (i32, i32) {
    %c0_i32 = arith.constant 0 : i32
    %c0_i32_0 = arith.constant 0 : i32
    %c0_i32_1 = arith.constant 0 : i32
    return %c0_i32, %c0_i32_0 : i32, i32
  }
  func.func @transform_8(%arg0: i32) -> (i32, i32) {
    %c0_i32 = arith.constant 0 : i32
    %c0_i32_0 = arith.constant 0 : i32
    %c0_i32_1 = arith.constant 0 : i32
    return %c0_i32, %c0_i32_0 : i32, i32
  }
  func.func @transform_9(%arg0: i32) -> (i32, i32) {
    %c0_i32 = arith.constant 0 : i32
    %c0_i32_0 = arith.constant 0 : i32
    %c0_i32_1 = arith.constant 0 : i32
    return %c0_i32, %c0_i32_0 : i32, i32
  }
  func.func @transform_10(%arg0: i32) -> (i32, i32) {
    %c0_i32 = arith.constant 0 : i32
    %c0_i32_0 = arith.constant 0 : i32
    %c0_i32_1 = arith.constant 0 : i32
    return %c0_i32, %c0_i32_0 : i32, i32
  }
  func.func @transform_11(%arg0: i32) -> (i32, i32) {
    %c0_i32 = arith.constant 0 : i32
    %c0_i32_0 = arith.constant 0 : i32
    %c0_i32_1 = arith.constant 0 : i32
    return %c0_i32, %c0_i32_0 : i32, i32
  }
  func.func @transform_12(%arg0: i32) -> (i32, i32) {
    %c0_i32 = arith.constant 0 : i32
    %c0_i32_0 = arith.constant 0 : i32
    %c0_i32_1 = arith.constant 0 : i32
    return %c0_i32, %c0_i32_0 : i32, i32
  }
  func.func @transform_13(%arg0: i32) -> (i32, i32) {
    %c0_i32 = arith.constant 0 : i32
    %c0_i32_0 = arith.constant 0 : i32
    %c0_i32_1 = arith.constant 0 : i32
    return %c0_i32, %c0_i32_0 : i32, i32
  }
  func.func @transform_14(%arg0: i32) -> (i32, i32) {
    %c0_i32 = arith.constant 0 : i32
    %c0_i32_0 = arith.constant 0 : i32
    %c0_i32_1 = arith.constant 0 : i32
    return %c0_i32, %c0_i32_0 : i32, i32
  }
  func.func @transform_15(%arg0: i32) -> (i32, i32) {
    %c0_i32 = arith.constant 0 : i32
    %c0_i32_0 = arith.constant 0 : i32
    %c0_i32_1 = arith.constant 0 : i32
    return %c0_i32, %c0_i32_0 : i32, i32
  }
  func.func @transform_16(%arg0: i32) -> (i32, i32) {
    %c0_i32 = arith.constant 0 : i32
    %c0_i32_0 = arith.constant 0 : i32
    %c0_i32_1 = arith.constant 0 : i32
    return %c0_i32, %c0_i32_0 : i32, i32
  }
  func.func @transform_17(%arg0: i32) -> (i32, i32) {
    %c0_i32 = arith.constant 0 : i32
    %c0_i32_0 = arith.constant 0 : i32
    %c0_i32_1 = arith.constant 0 : i32
    return %c0_i32, %c0_i32_0 : i32, i32
  }
}

</mosaic_0001>

<bundles_post_ra>
// kernel: tpu_custom_call.1
= control target key start
LH: loop header
LB: loop body
LE: loop exit
PB: predicated region body
PF: predicated region fallthrough
CT: control target
= control target key end

     0   :  { %s3276_s0 = inlined_call_operand.vmem [shape: f32[128,12], index: 0, kind: input, shape index: {}]   ;;  %s3277_s1 = inlined_call_operand.vmem [shape: s32[128,2], index: 1, kind: input, shape index: {}]   ;;  %s3278_s2 = inlined_call_operand.vmem [shape: s32[1,1,128], index: 2, kind: input, shape index: {}]   ;;  %s3279_s3 = inlined_call_operand.vmem [shape: f32[16,128], index: 3, kind: input, shape index: {}]   ;;  %s3280_s4 = inlined_call_operand.hbm [shape: f32[12,128], index: 4, kind: input, shape index: {}]   ;;  %s3281_s5 = inlined_call_operand.vmem [shape: f32[128,128], index: 5, kind: input, shape index: {}]   ;;  %s3282_s6 = inlined_call_operand.vmem [shape: f32[128,128], index: 6, kind: input, shape index: {}]   ;;  %s3283_s7 = inlined_call_operand.vmem [shape: f32[1,128], index: 7, kind: input, shape index: {}]   ;;  %s3284_s8 = inlined_call_operand.hbm [shape: f32[128,128], index: 8, kind: input, shape index: {}]   ;;  %s3285_s9 = inlined_call_operand.vmem [shape: f32[1,128], index: 9, kind: input, shape index: {}]   ;;  %s3286_s10 = inlined_call_operand.vmem [shape: f32[1,128], index: 10, kind: input, shape index: {}]   ;;  %s3287_s11 = inlined_call_operand.<no memory space> [shape: f32[1,1], index: 11, kind: input, shape index: {}]   ;;  %s3288_s12 = inlined_call_operand.hbm [shape: f32[128,128], index: 12, kind: input, shape index: {}]   ;;  %s3289_s13 = inlined_call_operand.hbm [shape: f32[128,128], index: 13, kind: input, shape index: {}]   ;;  %s3290_s14 = inlined_call_operand.vmem [shape: f32[1,128], index: 14, kind: input, shape index: {}]   ;;  %s3291_s15 = inlined_call_operand.hbm [shape: f32[128,128], index: 15, kind: input, shape index: {}]   ;;  %s3292_s16 = inlined_call_operand.vmem [shape: f32[1,128], index: 16, kind: input, shape index: {}]   ;;  %s3293_s17 = inlined_call_operand.hbm [shape: f32[16,128], index: 17, kind: output, shape index: {}]  }
   0x1   :  { %3296 = sst [smem:[#allocation19_spill]] %s3276_s0  ;;  %v22_v0 = vstv %s3287_s11 }
   0x2   :  { %3297 = sst [smem:[#allocation20_spill]] %s3277_s1  ;;  %23 = vst [vmem:[#allocation4] sm:$0x1] %v22_v0 }
   0x3   :  { %24 = vsyncpa [#allocation6], 0 }
   0x4   :  { %25 = vsyncpa [#allocation9], 0 }
   0x5   :  { %26 = vsyncpa [#allocation12], 0 }
   0x6   :  { %27 = vsyncpa [#allocation7], 0  ;;  %s2627_s26 = smov [#allocation8]   ;;  %s2628_s28 = smov [#allocation11]  }
   0x7   :  { %s59_s27 = sshll.u32 %s2627_s26, 4  ;;  %s89_s29 = sshll.u32 %s2628_s28, 4  ;;  %s60_s27 = int_to_ptr.vmem [resolvable:$true] %s59_s27  ;;  %s90_s29 = int_to_ptr.vmem [resolvable:$true] %s89_s29 }
   0x8   :  { %s2507_s0 = scalar_lea.vmem %s60_s27, 2048  ;;  %p2512_p1 = scmp.lt.s32.totalorder %s60_s27, %s60_s27 }
   0x9   :  { %p2508_p0 = scmp.ne.s32.totalorder %s60_s27, %s2507_s0  ;;  %p2513_p2 = scmp.lt.s32.totalorder %s2507_s0, %s2507_s0 }
   0xb   :  { %p2514_p3 = por %p2513_p2, %p2512_p1 }
   0xd   :  { %p2515_p4 = pnand %p2514_p3, %p2508_p0 }
   0xf   :  { %2518 = shalt.err (!%p2515_p4)
}
  0x10   :  { %s2629_s30 = smov 128   ;;  %s2630_s11 = smov 8  }
  0x11   :  { %65 = dma.hbm_to_vmem [thread:$0]  %s3284_s8, 2048, %s60_s27, [#allocation9], %s2629_s30, %s2629_s30, %s2630_s11  }
  0x12   :  { %s2527_s1 = scalar_lea.vmem %s90_s29, 2048  ;;  %p2532_p6 = scmp.lt.s32.totalorder %s90_s29, %s90_s29 }
  0x13   :  { %p2528_p5 = scmp.ne.s32.totalorder %s90_s29, %s2527_s1  ;;  %p2533_p7 = scmp.lt.s32.totalorder %s2527_s1, %s2527_s1 }
  0x15   :  { %p2534_p8 = por %p2533_p7, %p2532_p6 }
  0x17   :  { %p2535_p9 = pnand %p2534_p8, %p2528_p5 }
  0x19   :  { %2538 = shalt.err (!%p2535_p9)
}
  0x1a   :  { %95 = dma.hbm_to_vmem [thread:$0]  %s3289_s13, 2048, %s90_s29, [#allocation12], %s2629_s30, %s2629_s30, %s2630_s11  }
  0x1b   :  { %s2631_s22 = smov [#allocation5]   ;;  %s2632_s24 = smov [#allocation10]  }
  0x1c   :  { %s41_s23 = sshll.u32 %s2631_s22, 4  ;;  %s77_s25 = sshll.u32 %s2632_s24, 4  ;;  %s42_s23 = int_to_ptr.vmem [resolvable:$true] %s41_s23  ;;  %s78_s25 = int_to_ptr.vmem [resolvable:$true] %s77_s25 }
  0x1d   :  { %s2547_s8 = scalar_lea.vmem %s42_s23, 256  ;;  %p2552_p11 = scmp.lt.s32.totalorder %s42_s23, %s42_s23 }
  0x1e   :  { %p2548_p10 = scmp.ne.s32.totalorder %s42_s23, %s2547_s8  ;;  %p2553_p12 = scmp.lt.s32.totalorder %s2547_s8, %s2547_s8 }
  0x20   :  { %p2554_p13 = por %p2553_p12, %p2552_p11 }
  0x22   :  { %p2555_p0 = pnand %p2554_p13, %p2548_p10 }
  0x24   :  { %2558 = shalt.err (!%p2555_p0)
}
  0x25   :  { %47 = dma.hbm_to_vmem [thread:$0]  %s3280_s4, 256, %s42_s23, [#allocation6], %s2629_s30, %s2629_s30, %s2630_s11  }
  0x26   :  { %s2567_s13 = scalar_lea.vmem %s78_s25, 2048  ;;  %p2572_p2 = scmp.lt.s32.totalorder %s78_s25, %s78_s25 }
  0x27   :  { %p2568_p1 = scmp.ne.s32.totalorder %s78_s25, %s2567_s13  ;;  %p2573_p3 = scmp.lt.s32.totalorder %s2567_s13, %s2567_s13 }
  0x29   :  { %p2574_p4 = por %p2573_p3, %p2572_p2 }
  0x2b   :  { %p2575_p5 = pnand %p2574_p4, %p2568_p1 }
  0x2d   :  { %2578 = shalt.err (!%p2575_p5)
}
  0x2e   :  { %83 = dma.hbm_to_vmem [thread:$0]  %s3288_s12, 2048, %s78_s25, [#allocation9], %s2629_s30, %s2629_s30, %s2630_s11  }
  0x2f   :  { %s2633_s0 = smov [#allocation13]  }
  0x30   :  { %s103_s18 = sshll.u32 %s2633_s0, 4  ;;  %s104_s18 = int_to_ptr.vmem [resolvable:$true] %s103_s18 }
  0x31   :  { %s2587_s19 = scalar_lea.vmem %s104_s18, 2048  ;;  %p2592_p7 = scmp.lt.s32.totalorder %s104_s18, %s104_s18 }
  0x32   :  { %p2588_p6 = scmp.ne.s32.totalorder %s104_s18, %s2587_s19  ;;  %p2593_p8 = scmp.lt.s32.totalorder %s2587_s19, %s2587_s19 }
  0x34   :  { %p2594_p9 = por %p2593_p8, %p2592_p7 }
  0x36   :  { %p2595_p10 = pnand %p2594_p9, %p2588_p6 }
  0x38   :  { %2598 = shalt.err (!%p2595_p10)
}
  0x39   :  { %109 = dma.hbm_to_vmem [thread:$0]  %s3291_s15, 2048, %s104_s18, [#allocation12], %s2629_s30, %s2629_s30, %s2630_s11  }
  0x3a   :  { %2619 = dma.done.wait [#allocation6], 256  }
  0x3b   :  { %2620 = vsyncadd [#allocation6], 4294967040 }
  0x3c   :  { %2621 = dma.done.wait [#allocation9], 4096  }
  0x3d   :  { %2622 = vsyncadd [#allocation9], 4294963200 }
  0x3e   :  { %2623 = dma.done.wait [#allocation12], 4096  }
  0x3f   :  { %2624 = vsyncadd [#allocation12], 4294963200  ;;  %v2634_v1 = vmov 0   ;;  %v241_v2 = vld [vmem:[%s3282_s6 + $0x78] sm:$0xff]  ;;  %v240_v4 = vld [vmem:[%s3282_s6 + $0x70] sm:$0xff]  ;;  %s3298_s29 = sld [smem:[#allocation20_spill]] }
  0x40   :  { %2430 = vset.pattern.permute.xlu1 %v2634_v1  ;;  %2429 = vset.pattern.permute.xlu0 %v2634_v1  ;;  %v148_v3 = vld [vmem:[%s3281_s5 + $0x78] sm:$0xff]  ;;  %v147_v5 = vld [vmem:[%s3281_s5 + $0x70] sm:$0xff]  ;;  %v239_v6 = vld [vmem:[%s3282_s6 + $0x68] sm:$0xff]  ;;  %v2635_v28 = vmov 1   ;;  %vm781_vm0 = vcmask 1043456   ;;  %s3299_s25 = sld [smem:[#allocation19_spill]] }
  0x41   :  { %2126 = vmatprep.subr.mxu1 %v241_v2  ;;  %2091 = vmatprep.subr.mxu0 %v148_v3  ;;  %v146_v7 = vld [vmem:[%s3281_s5 + $0x68] sm:$0xff]  ;;  %v238_v8 = vld [vmem:[%s3282_s6 + $0x60] sm:$0xff]  ;;  %v237_v10 = vld [vmem:[%s3282_s6 + $0x58] sm:$0xff]  ;;  %vm732_vm1 = vcmask 97280   ;;  %vm538_vm3 = vcmask 261120  }
  0x42   :  { %2127 = vmatpush3.msra.mxu1 %v241_v2  ;;  %2092 = vmatpush3.msra.mxu0 %v148_v3  ;;  %v145_v9 = vld [vmem:[%s3281_s5 + $0x60] sm:$0xff]  ;;  %v144_v11 = vld [vmem:[%s3281_s5 + $0x58] sm:$0xff]  ;;  %v236_v12 = vld [vmem:[%s3282_s6 + $0x50] sm:$0xff] }
  0x43   :  { %2128 = vmatprep.subr.mxu1 %v240_v4  ;;  %2093 = vmatprep.subr.mxu0 %v147_v5  ;;  %v143_v13 = vld [vmem:[%s3281_s5 + $0x50] sm:$0xff]  ;;  %v235_v14 = vld [vmem:[%s3282_s6 + $0x48] sm:$0xff]  ;;  %v234_v16 = vld [vmem:[%s3282_s6 + $0x40] sm:$0xff] }
  0x44   :  { %2129 = vmatpush3.msra.mxu1 %v240_v4  ;;  %2094 = vmatpush3.msra.mxu0 %v147_v5  ;;  %v142_v15 = vld [vmem:[%s3281_s5 + $0x48] sm:$0xff]  ;;  %v141_v18 = vld [vmem:[%s3281_s5 + $0x40] sm:$0xff]  ;;  %v233_v19 = vld [vmem:[%s3282_s6 + $0x38] sm:$0xff] }
  0x45   :  { %2130 = vmatprep.subr.mxu1 %v239_v6  ;;  %2095 = vmatprep.subr.mxu0 %v146_v7  ;;  %v322_v17 = vld [vmem:[%s3298_s29 + $0x8] sm:$0xff]  ;;  %v321_v20 = vld [vmem:[%s3298_s29] sm:$0xff]  ;;  %v140_v21 = vld [vmem:[%s3281_s5 + $0x38] sm:$0xff] }
  0x46   :  { %2131 = vmatpush3.msra.mxu1 %v239_v6  ;;  %2096 = vmatpush3.msra.mxu0 %v146_v7  ;;  %v232_v22 = vld [vmem:[%s3282_s6 + $0x30] sm:$0xff]  ;;  %v231_v25 = vld [vmem:[%s3282_s6 + $0x28] sm:$0xff]  ;;  %v340_v26 = vadd.s32 16, %v321_v20  ;;  %v230_v29 = vld [vmem:[%s3282_s6 + $0x20] sm:$0xff]  ;;  %v341_v30 = vadd.s32 16, %v322_v17 }
  0x47   :  { %2132 = vmatprep.subr.mxu1 %v238_v8  ;;  %2097 = vmatprep.subr.mxu0 %v145_v9  ;;  %v323_v23 = vld [vmem:[%s3298_s29 + $0x10] sm:$0xff]  ;;  %v138_v27 = vld [vmem:[%s3281_s5 + $0x28] sm:$0xff]  ;;  %v137_v31 = vld [vmem:[%s3281_s5 + $0x20] sm:$0xff] }
  0x48   :  { %2133 = vmatpush3.msra.mxu1 %v238_v8  ;;  %2098 = vmatpush3.msra.mxu0 %v145_v9  ;;  %v139_v24 = vld [vmem:[%s3281_s5 + $0x30] sm:$0xff]  ;;  %v229_v32 = vld [vmem:[%s3282_s6 + $0x18] sm:$0xff]  ;;  %v342_v33 = vadd.s32 16, %v323_v23  ;;  %v227_v38 = vld [vmem:[%s3282_s6 + $0x8] sm:$0xff] }
  0x49   :  { %2134 = vmatprep.subr.mxu1 %v237_v10  ;;  %2099 = vmatprep.subr.mxu0 %v144_v11  ;;  %v136_v34 = vld [vmem:[%s3281_s5 + $0x18] sm:$0xff]  ;;  %v228_v35 = vld [vmem:[%s3282_s6 + $0x10] sm:$0xff]  ;;  %v134_v40 = vld [vmem:[%s3281_s5 + $0x8] sm:$0xff] }
  0x4a   :  { %2135 = vmatpush3.msra.mxu1 %v237_v10  ;;  %2100 = vmatpush3.msra.mxu0 %v144_v11  ;;  %v324_v36 = vld [vmem:[%s3298_s29 + $0x18] sm:$0xff]  ;;  %v135_v37 = vld [vmem:[%s3281_s5 + $0x10] sm:$0xff]  ;;  %v226_v41 = vld [vmem:[%s3282_s6] sm:$0xff] }
  0x4b   :  { %2136 = vmatprep.subr.mxu1 %v236_v12  ;;  %2101 = vmatprep.subr.mxu0 %v143_v13  ;;  %v343_v39 = vadd.s32 16, %v324_v36  ;;  %v325_v42 = vld [vmem:[%s3298_s29 + $0x20] sm:$0xff]  ;;  %v132_v45 = vld [vmem:[%s3279_s3 + $0x8] sm:$0xff]  ;;  %v327_v49 = vld [vmem:[%s3298_s29 + $0x30] sm:$0xff] }
  0x4c   :  { %2137 = vmatpush3.msra.mxu1 %v236_v12  ;;  %2102 = vmatpush3.msra.mxu0 %v143_v13  ;;  %v131_v43 = vld [vmem:[%s3279_s3] sm:$0xff]  ;;  %v344_v46 = vadd.s32 16, %v325_v42  ;;  %v326_v47 = vld [vmem:[%s3298_s29 + $0x28] sm:$0xff]  ;;  %v346_v50 = vadd.s32 16, %v327_v49  ;;  %v328_v51 = vld [vmem:[%s3298_s29 + $0x38] sm:$0xff] }
  0x4d   :  { %2138 = vmatprep.subr.mxu1 %v235_v14  ;;  %2103 = vmatprep.subr.mxu0 %v142_v15  ;;  %v133_v44 = vld [vmem:[%s3281_s5] sm:$0xff]  ;;  %v345_v48 = vadd.s32 16, %v326_v47  ;;  %v347_v52 = vadd.s32 16, %v328_v51  ;;  %v330_v55 = vld [vmem:[%s3298_s29 + $0x48] sm:$0xff]  ;;  %v331_v57 = vld [vmem:[%s3298_s29 + $0x50] sm:$0xff] }
  0x4e   :  { %2139 = vmatpush3.msra.mxu1 %v235_v14  ;;  %2104 = vmatpush3.msra.mxu0 %v142_v15  ;;  %v329_v53 = vld [vmem:[%s3298_s29 + $0x40] sm:$0xff]  ;;  %v349_v56 = vadd.s32 16, %v330_v55  ;;  %v350_v58 = vadd.s32 16, %v331_v57  ;;  %v332_v59 = vld [vmem:[%s3298_s29 + $0x58] sm:$0xff]  ;;  %v334_v63 = vld [vmem:[%s3298_s29 + $0x68] sm:$0xff] }
  0x4f   :  { %2140 = vmatprep.subr.mxu1 %v234_v16  ;;  %360 = vperm.xlu1 %2430, %v322_v17   ;;  %v348_v54 = vadd.s32 16, %v329_v53  ;;  %v351_v60 = vadd.s32 16, %v332_v59  ;;  %v333_v61 = vld [vmem:[%s3298_s29 + $0x60] sm:$0xff]  ;;  %v353_v0 = vadd.s32 16, %v334_v63  ;;  %v335_v2 = vld [vmem:[%s3298_s29 + $0x70] sm:$0xff]  ;;  %v336_v4 = vld [vmem:[%s3298_s29 + $0x78] sm:$0xff] }
  0x50   :  { %2141 = vmatpush3.msra.mxu1 %v234_v16  ;;  %2105 = vmatprep.subr.mxu0 %v141_v18  ;;  %v352_v62 = vadd.s32 16, %v333_v61  ;;  %v354_v3 = vadd.s32 16, %v335_v2  ;;  %v355_v5 = vadd.s32 16, %v336_v4  ;;  %v533_v6 = vld [vmem:[#allocation5 + $0x8] sm:$0xf]  ;;  %v532_v7 = vld [vmem:[#allocation5] sm:$0xff] }
  0x51   :  { %2142 = vmatprep.subr.mxu1 %v233_v19  ;;  %357 = vperm.xlu0 %2429, %v321_v20   ;;  %v516_v8 = vld [vmem:[%s3299_s25] sm:$0xff]  ;;  %v517_v9 = vld [vmem:[%s3299_s25 + $0x8] sm:$0xff]  ;;  %v519_v10 = vld [vmem:[%s3299_s25 + $0x18] sm:$0xff]  ;;  %s2638_s29 = smov [#allocation14]  }
  0x52   :  { %2106 = vmatpush3.msra.mxu0 %v141_v18  ;;  %2143 = vmatpush3.msra.mxu1 %v233_v19  ;;  %v520_v11 = vld [vmem:[%s3299_s25 + $0x20] sm:$0xff]  ;;  %v521_v12 = vld [vmem:[%s3299_s25 + $0x28] sm:$0xff]  ;;  %v522_v13 = vld [vmem:[%s3299_s25 + $0x30] sm:$0xff]  ;;  %s1823_s8 = sshll.u32 %s2638_s29, 4  ;;  %s1824_s8 = int_to_ptr.vmem [resolvable:$true] %s1823_s8 }
  0x53   :  { %2107 = vmatprep.subr.mxu0 %v140_v21  ;;  %2144 = vmatprep.subr.mxu1 %v232_v22  ;;  %v523_v14 = vld [vmem:[%s3299_s25 + $0x38] sm:$0xff]  ;;  %v524_v15 = vld [vmem:[%s3299_s25 + $0x40] sm:$0xff]  ;;  %v525_v16 = vld [vmem:[%s3299_s25 + $0x48] sm:$0xff]  ;;  %p2604_p12 = scmp.lt.s32.totalorder %s1824_s8, %s1824_s8 }
  0x54   :  { %2108 = vmatpush3.msra.mxu0 %v140_v21  ;;  %2145 = vmatpush3.msra.mxu1 %v232_v22  ;;  %v526_v17 = vld [vmem:[%s3299_s25 + $0x50] sm:$0xff]  ;;  %v527_v18 = vld [vmem:[%s3299_s25 + $0x58] sm:$0xff]  ;;  %v528_v19 = vld [vmem:[%s3299_s25 + $0x60] sm:$0xff] }
  0x55   :  { %363 = vperm.xlu1 %2430, %v323_v23   ;;  %2109 = vmatprep.subr.mxu0 %v139_v24  ;;  %v529_v20 = vld [vmem:[%s3299_s25 + $0x68] sm:$0xff]  ;;  %v530_v21 = vld [vmem:[%s3299_s25 + $0x70] sm:$0xff]  ;;  %v531_v22 = vld [vmem:[%s3299_s25 + $0x78] sm:$0xff]  ;;  %v337_v23 = vlaneseq }
  0x56   :  { %2146 = vmatprep.subr.mxu1 %v231_v25  ;;  %2431 = vset.pattern.permute.xlu0 %v2635_v28 }
  0x57   :  { %2110 = vmatpush3.msra.mxu0 %v139_v24  ;;  %2147 = vmatpush3.msra.mxu1 %v231_v25  ;;  %v984_v25 = vld [vmem:[#allocation8 + $0x78] sm:$0xff] }
  0x58   :  { %405 = vperm.xlu0 %2431, %v340_v26   ;;  %2111 = vmatprep.subr.mxu0 %v138_v27  ;;  %v983_v26 = vld [vmem:[#allocation8 + $0x70] sm:$0xff] }
  0x59   :  { %2148 = vmatprep.subr.mxu1 %v230_v29  ;;  %2112 = vmatpush3.msra.mxu0 %v138_v27 }
  0x5a   :  { %2149 = vmatpush3.msra.mxu1 %v230_v29  ;;  %2432 = vset.pattern.permute.xlu1 %v2635_v28  ;;  %v2981_v28 = vand.u32 127, %v337_v23  ;;  %v982_v29 = vld [vmem:[#allocation8 + $0x68] sm:$0xff] }
  0x5b   :  { %2113 = vmatprep.subr.mxu0 %v137_v31  ;;  %2150 = vmatprep.subr.mxu1 %v229_v32 }
  0x5c   :  { %408 = vperm.xlu1 %2432, %v341_v30   ;;  %2114 = vmatpush3.msra.mxu0 %v137_v31  ;;  %v981_v30 = vld [vmem:[#allocation8 + $0x60] sm:$0xff]  ;;  %vm339_vm2 = vcmp.lt.s32.totalorder %v2981_v28, 16 }
  0x5d   :  { %2151 = vmatpush3.msra.mxu1 %v229_v32  ;;  %411 = vperm.xlu0 %2431, %v342_v33   ;;  %v980_v32 = vld [vmem:[#allocation8 + $0x58] sm:$0xff] }
  0x5e   :  { %2115 = vmatprep.subr.mxu0 %v136_v34  ;;  %2152 = vmatprep.subr.mxu1 %v228_v35 }
  0x5f   :  { %2116 = vmatpush3.msra.mxu0 %v136_v34  ;;  %2153 = vmatpush3.msra.mxu1 %v228_v35  ;;  %v979_v34 = vld [vmem:[#allocation8 + $0x50] sm:$0xff] }
  0x60   :  { %2117 = vmatprep.subr.mxu0 %v135_v37  ;;  %2154 = vmatprep.subr.mxu1 %v227_v38 }
  0x61   :  { %2433 = vset.pattern.permute.xlu1 %v2634_v1  ;;  %2118 = vmatpush3.msra.mxu0 %v135_v37  ;;  %v2636_v37 = vmov 0.0  }
  0x62   :  { %2155 = vmatpush3.msra.mxu1 %v227_v38  ;;  %366 = vperm.xlu1 %2433, %v324_v36   ;;  %v978_v36 = vld [vmem:[#allocation8 + $0x48] sm:$0xff] }
  0x63   :  { %414 = vperm.xlu0 %2431, %v343_v39   ;;  %2119 = vmatprep.subr.mxu0 %v134_v40 }
  0x64   :  { %2156 = vmatprep.subr.mxu1 %v226_v41  ;;  %2120 = vmatpush3.msra.mxu0 %v134_v40  ;;  %v977_v40 = vld [vmem:[#allocation8 + $0x40] sm:$0xff] }
  0x65   :  { %2157 = vmatpush3.msra.mxu1 %v226_v41  ;;  %2158 = vmatprep.mubr.f32.mxu1 %v131_v43 }
  0x66   :  { %2121 = vmatprep.subr.mxu0 %v133_v44  ;;  %2159 = vmatmul.mubr.f32.vlgmr.msra.gmra.mxu1 %v132_v45 }
  0x67   :  { %2122 = vmatpush3.msra.mxu0 %v133_v44  ;;  %2123 = vmatprep.mubr.f32.mxu0 %v131_v43  ;;  %v976_v44 = vld [vmem:[#allocation8 + $0x38] sm:$0xff] }
  0x68   :  { %369 = vperm.xlu1 %2433, %v325_v42   ;;  %417 = vperm.xlu0 %2431, %v344_v46  }
  0x69   :  { %2124 = vmatmul.mubr.f32.vlgmr.msra.gmra.mxu0 %v132_v45  ;;  %2193 = vmatprep.subr.msk.mxu1 %vm781_vm0, %v533_v6 }
  0x6a   :  { %2194 = vmatpush3.msk.msra.mxu1 %vm781_vm0, %v533_v6  ;;  %2197 = vmatprep.mubr.msk.f32.mxu1 %vm732_vm1, %v516_v8 }
  0x6b   :  { %2195 = vmatprep.subr.mxu1 %v532_v7 }
  0x6c   :  { %372 = vperm.xlu1 %2433, %v326_v47   ;;  %420 = vperm.xlu0 %2431, %v345_v48   ;;  %v975_v47 = vld [vmem:[#allocation8 + $0x30] sm:$0xff] }
  0x6d   :  { %2196 = vmatpush3.msra.mxu1 %v532_v7 }
  0x6e   :  { %2198 = vmatmul.mubr.msk.f32.vlgmr.msra.gmra.mxu1 %vm732_vm1, %v517_v9  ;;  %2221 = vmatprep.subr.mxu1 %v984_v25 }
  0x6f   :  { %2222 = vmatpush3.msra.mxu1 %v984_v25 }
  0x70   :  { %375 = vperm.xlu1 %2433, %v327_v49   ;;  %423 = vperm.xlu0 %2431, %v346_v50  }
  0x71   :  { %2223 = vmatprep.subr.mxu1 %v983_v26 }
  0x72   :  { %2224 = vmatpush3.msra.mxu1 %v983_v26 }
  0x73   :  { %2225 = vmatprep.subr.mxu1 %v982_v29 }
  0x74   :  { %378 = vperm.xlu1 %2433, %v328_v51   ;;  %426 = vperm.xlu0 %2431, %v347_v52  }
  0x75   :  { %2226 = vmatpush3.msra.mxu1 %v982_v29 }
  0x76   :  { %2227 = vmatprep.subr.mxu1 %v981_v30 }
  0x77   :  { %2228 = vmatpush3.msra.mxu1 %v981_v30 }
  0x78   :  { %381 = vperm.xlu1 %2433, %v329_v53   ;;  %429 = vperm.xlu0 %2431, %v348_v54  }
  0x79   :  { %2229 = vmatprep.subr.mxu1 %v980_v32 }
  0x7a   :  { %2230 = vmatpush3.msra.mxu1 %v980_v32 }
  0x7b   :  { %2231 = vmatprep.subr.mxu1 %v979_v34 }
  0x7c   :  { %384 = vperm.xlu1 %2433, %v330_v55   ;;  %432 = vperm.xlu0 %2431, %v349_v56  }
  0x7d   :  { %2232 = vmatpush3.msra.mxu1 %v979_v34 }
  0x7e   :  { %2233 = vmatprep.subr.mxu1 %v978_v36 }
  0x7f   :  { %2234 = vmatpush3.msra.mxu1 %v978_v36 }
  0x80   :  { %387 = vperm.xlu1 %2433, %v331_v57   ;;  %435 = vperm.xlu0 %2431, %v350_v58  }
  0x81   :  { %2235 = vmatprep.subr.mxu1 %v977_v40 }
  0x82   :  { %2236 = vmatpush3.msra.mxu1 %v977_v40 }
  0x83   :  { %2237 = vmatprep.subr.mxu1 %v976_v44 }
  0x84   :  { %390 = vperm.xlu1 %2433, %v332_v59   ;;  %438 = vperm.xlu0 %2431, %v351_v60  }
  0x85   :  { %2238 = vmatpush3.msra.mxu1 %v976_v44  ;;  %v971_v44 = vld [vmem:[#allocation8 + $0x10] sm:$0xff] }
  0x86   :  { %2239 = vmatprep.subr.mxu1 %v975_v47 }
  0x87   :  { %2240 = vmatpush3.msra.mxu1 %v975_v47 }
  0x88   :  { %393 = vperm.xlu1 %2433, %v333_v61   ;;  %441 = vperm.xlu0 %2431, %v352_v62  }
  0x8c   :  { %396 = vperm.xlu1 %2433, %v334_v63   ;;  %444 = vperm.xlu0 %2431, %v353_v0   ;;  %v974_v0 = vld [vmem:[#allocation8 + $0x28] sm:$0xff] }
  0x8d   :  { %2241 = vmatprep.subr.mxu1 %v974_v0 }
  0x8e   :  { %2242 = vmatpush3.msra.mxu1 %v974_v0 }
  0x90   :  { %399 = vperm.xlu1 %2433, %v335_v2   ;;  %447 = vperm.xlu0 %2431, %v354_v3  }
  0x94   :  { %402 = vperm.xlu1 %2433, %v336_v4   ;;  %450 = vperm.xlu0 %2431, %v355_v5  }
  0x98   :  { %2434 = vset.pattern.permute.xlu0 %v2634_v1  ;;  %v518_v1 = vld [vmem:[%s3299_s25 + $0x10] sm:$0xff] }
  0x99   :  { %2200 = vmatprep.mubr.msk.f32.mxu1 %vm732_vm1, %v518_v1 }
  0x9a   :  { %2201 = vmatmul.mubr.msk.f32.gmra.mxu1 %vm732_vm1, %v519_v10 }
  0x9b   :  { %2203 = vmatprep.mubr.msk.f32.mxu1 %vm732_vm1, %v520_v11 }
  0x9e   :  { %2204 = vmatmul.mubr.msk.f32.gmra.mxu1 %vm732_vm1, %v521_v12 }
  0x9f   :  { %2206 = vmatprep.mubr.msk.f32.mxu1 %vm732_vm1, %v522_v13 }
  0xa2   :  { %2207 = vmatmul.mubr.msk.f32.gmra.mxu1 %vm732_vm1, %v523_v14 }
  0xa3   :  { %2209 = vmatprep.mubr.msk.f32.mxu1 %vm732_vm1, %v524_v15 }
  0xa6   :  { %2210 = vmatmul.mubr.msk.f32.gmra.mxu1 %vm732_vm1, %v525_v16 }
  0xa7   :  { %2212 = vmatprep.mubr.msk.f32.mxu1 %vm732_vm1, %v526_v17 }
  0xaa   :  { %2213 = vmatmul.mubr.msk.f32.gmra.mxu1 %vm732_vm1, %v527_v18 }
  0xab   :  { %2215 = vmatprep.mubr.msk.f32.mxu1 %vm732_vm1, %v528_v19 }
  0xae   :  { %2216 = vmatmul.mubr.msk.f32.gmra.mxu1 %vm732_vm1, %v529_v20 }
  0xaf   :  { %2218 = vmatprep.mubr.msk.f32.mxu1 %vm732_vm1, %v530_v21 }
  0xb2   :  { %2219 = vmatmul.mubr.msk.f32.gmra.mxu1 %vm732_vm1, %v531_v22 }
  0xca   :  { %v361_v24 = vpop.permute.xlu1 %360 }
  0xcc   :  { %v358_v27 = vpop.permute.xlu0 %357 }
  0xd0   :  { %v364_v31 = vpop.permute.xlu1 %363 }
  0xd3   :  { %v406_v33 = vpop.permute.xlu0 %405 }
  0xd4   :  { %v452_v35 = vsel %vm339_vm2, %v358_v27, %v406_v33 }
  0xd5   :  { %vm468_vm4 = vcmp.eq.s32.totalorder %v452_v35, %v2981_v28 }
  0xd6   :  { %v1837_v38 = vsel %vm468_vm4, 1.0, %v2636_v37 }
  0xd7   :  { %v409_v39 = vpop.permute.xlu1 %408  ;;  %2169 = vmatprep.mubr.msk.f32.mxu0 %vm538_vm3, %v1837_v38 }
  0xd8   :  { %v453_v41 = vsel %vm339_vm2, %v361_v24, %v409_v39  ;;  %v412_v42 = vpop.permute.xlu0 %411 }
  0xd9   :  { %vm469_vm5 = vcmp.eq.s32.totalorder %v453_v41, %v2981_v28  ;;  %v454_v43 = vsel %vm339_vm2, %v364_v31, %v412_v42 }
  0xda   :  { %v2995_v45 = vsel %vm469_vm5, 1.0, %v2636_v37  ;;  %vm470_vm6 = vcmp.eq.s32.totalorder %v454_v43, %v2981_v28 }
  0xdb   :  { %v2999_v46 = vsel %vm470_vm6, 1.0, %v2636_v37 }
  0xdd   :  { %v367_v48 = vpop.permute.xlu1 %366 }
  0xde   :  { %v415_v49 = vpop.permute.xlu0 %414 }
  0xdf   :  { %v455_v50 = vsel %vm339_vm2, %v367_v48, %v415_v49 }
  0xe0   :  { %vm471_vm7 = vcmp.eq.s32.totalorder %v455_v50, %v2981_v28 }
  0xe1   :  { %v3005_v51 = vsel %vm471_vm7, 1.0, %v2636_v37 }
  0xe3   :  { %v370_v52 = vpop.permute.xlu1 %369  ;;  %v418_v53 = vpop.permute.xlu0 %417 }
  0xe4   :  { %v456_v54 = vsel %vm339_vm2, %v370_v52, %v418_v53 }
  0xe5   :  { %vm472_vm8 = vcmp.eq.s32.totalorder %v456_v54, %v2981_v28 }
  0xe6   :  { %v3011_v55 = vsel %vm472_vm8, 1.0, %v2636_v37 }
  0xe7   :  { %v373_v56 = vpop.permute.xlu1 %372  ;;  %v421_v57 = vpop.permute.xlu0 %420 }
  0xe8   :  { %v457_v58 = vsel %vm339_vm2, %v373_v56, %v421_v57  ;;  %v3085_v57 = vld [vmem:[%s3283_s7] ss:$0 sm:$0xff] }
  0xe9   :  { %vm473_vm9 = vcmp.eq.s32.totalorder %v457_v58, %v2981_v28 }
  0xea   :  { %v3017_v59 = vsel %vm473_vm9, 1.0, %v2636_v37 }
  0xeb   :  { %v376_v60 = vpop.permute.xlu1 %375  ;;  %v424_v61 = vpop.permute.xlu0 %423 }
  0xec   :  { %v458_v62 = vsel %vm339_vm2, %v376_v60, %v424_v61 }
  0xed   :  { %vm474_vm10 = vcmp.eq.s32.totalorder %v458_v62, %v2981_v28 }
  0xee   :  { %v3023_v63 = vsel %vm474_vm10, 1.0, %v2636_v37 }
  0xef   :  { %v379_v2 = vpop.permute.xlu1 %378  ;;  %v427_v3 = vpop.permute.xlu0 %426 }
  0xf0   :  { %v459_v4 = vsel %vm339_vm2, %v379_v2, %v427_v3 }
  0xf1   :  { %vm475_vm11 = vcmp.eq.s32.totalorder %v459_v4, %v2981_v28 }
  0xf2   :  { %v1844_v5 = vsel %vm475_vm11, 1.0, %v2636_v37 }
  0xf3   :  { %v382_v6 = vpop.permute.xlu1 %381  ;;  %v430_v7 = vpop.permute.xlu0 %429 }
  0xf4   :  { %v460_v8 = vsel %vm339_vm2, %v382_v6, %v430_v7 }
  0xf5   :  { %vm476_vm12 = vcmp.eq.s32.totalorder %v460_v8, %v2981_v28 }
  0xf6   :  { %v1845_v9 = vsel %vm476_vm12, 1.0, %v2636_v37 }
  0xf7   :  { %v385_v1 = vpop.permute.xlu1 %384  ;;  %v433_v10 = vpop.permute.xlu0 %432 }
  0xf8   :  { %v461_v11 = vsel %vm339_vm2, %v385_v1, %v433_v10 }
  0xf9   :  { %vm477_vm13 = vcmp.eq.s32.totalorder %v461_v11, %v2981_v28 }
  0xfa   :  { %v1846_v12 = vsel %vm477_vm13, 1.0, %v2636_v37 }
  0xfb   :  { %v388_v13 = vpop.permute.xlu1 %387  ;;  %v436_v14 = vpop.permute.xlu0 %435 }
  0xfc   :  { %v462_v15 = vsel %vm339_vm2, %v388_v13, %v436_v14 }
  0xfd   :  { %vm478_vm14 = vcmp.eq.s32.totalorder %v462_v15, %v2981_v28 }
  0xfe   :  { %v1847_v16 = vsel %vm478_vm14, 1.0, %v2636_v37 }
  0xff   :  { %v391_v17 = vpop.permute.xlu1 %390  ;;  %v439_v18 = vpop.permute.xlu0 %438 }
 0x100   :  { %v463_v19 = vsel %vm339_vm2, %v391_v17, %v439_v18 }
 0x101   :  { %vm479_vm15 = vcmp.eq.s32.totalorder %v463_v19, %v2981_v28 }
 0x102   :  { %v1848_v20 = vsel %vm479_vm15, 1.0, %v2636_v37 }
 0x103   :  { %v394_v21 = vpop.permute.xlu1 %393  ;;  %v442_v22 = vpop.permute.xlu0 %441 }
 0x104   :  { %v464_v24 = vsel %vm339_vm2, %v394_v21, %v442_v22 }
 0x105   :  { %vm480_vm0 = vcmp.eq.s32.totalorder %v464_v24, %v2981_v28 }
 0x106   :  { %v1849_v25 = vsel %vm480_vm0, 1.0, %v2636_v37 }
 0x107   :  { %v397_v26 = vpop.permute.xlu1 %396  ;;  %v445_v27 = vpop.permute.xlu0 %444 }
 0x108   :  { %v465_v29 = vsel %vm339_vm2, %v397_v26, %v445_v27 }
 0x109   :  { %vm481_vm1 = vcmp.eq.s32.totalorder %v465_v29, %v2981_v28 }
 0x10a   :  { %v1850_v30 = vsel %vm481_vm1, 1.0, %v2636_v37 }
 0x10b   :  { %v400_v31 = vpop.permute.xlu1 %399  ;;  %v448_v32 = vpop.permute.xlu0 %447 }
 0x10c   :  { %v466_v33 = vsel %vm339_vm2, %v400_v31, %v448_v32 }
 0x10d   :  { %vm482_vm4 = vcmp.eq.s32.totalorder %v466_v33, %v2981_v28 }
 0x10e   :  { %v1851_v34 = vsel %vm482_vm4, 1.0, %v2636_v37 }
 0x10f   :  { %v403_v35 = vpop.permute.xlu1 %402  ;;  %v451_v36 = vpop.permute.xlu0 %450 }
 0x110   :  { %v467_v38 = vsel %vm339_vm2, %v403_v35, %v451_v36 }
 0x111   :  { %vm483_vm5 = vcmp.eq.s32.totalorder %v467_v38, %v2981_v28  ;;  %v973_v28 = vld [vmem:[#allocation8 + $0x20] sm:$0xff] }
 0x112   :  { %v1852_v39 = vsel %vm483_vm5, 1.0, %v2636_v37  ;;  %2243 = vmatprep.subr.mxu1 %v973_v28  ;;  %v972_v37 = vld [vmem:[#allocation8 + $0x18] sm:$0xff] }
 0x113   :  { %2244 = vmatpush3.msra.mxu1 %v973_v28 }
 0x114   :  { %2245 = vmatprep.subr.mxu1 %v972_v37 }
 0x115   :  { %2246 = vmatpush3.msra.mxu1 %v972_v37 }
 0x116   :  { %2247 = vmatprep.subr.mxu1 %v971_v44 }
 0x117   :  { %2248 = vmatpush3.msra.mxu1 %v971_v44 }
 0x126   :  { %v2160_v40 = vpop.f32.mrf.mxu1 }
 0x127   :  { %2161 = vmatprep.subr.mxu0 %v2160_v40 }
 0x128   :  { %v308_v41 = vpop.f32.mrf.mxu1  ;;  %2162 = vmatpush3.msra.mxu0 %v2160_v40 }
 0x129   :  { %v2125_v42 = vpop.f32.mrf.mxu0  ;;  %2163 = vmatprep.subr.mxu0 %v308_v41 }
 0x12a   :  { %2164 = vmatpush3.msra.mxu0 %v308_v41 }
 0x12b   :  { %2165 = vmatprep.subr.mxu0 %v2125_v42  ;;  %v215_v43 = vpop.f32.mrf.mxu0 }
 0x12c   :  { %2166 = vmatpush3.msra.mxu0 %v2125_v42 }
 0x12d   :  { %2167 = vmatprep.subr.mxu0 %v215_v43 }
 0x12e   :  { %2168 = vmatpush3.msra.mxu0 %v215_v43  ;;  %v2199_v47 = vpop.f32.mrf.mxu1 }
 0x12f   :  { %2170 = vmatmul.mubr.msk.f32.vlgmr.msra.gmra.mxu0 %vm538_vm3, %v2995_v45  ;;  %v970_v45 = vld [vmem:[#allocation8 + $0x8] sm:$0xff] }
 0x130   :  { %2172 = vmatprep.mubr.msk.f32.mxu0 %vm538_vm3, %v2999_v46  ;;  %2249 = vmatprep.subr.mxu1 %v970_v45  ;;  %v969_v46 = vld [vmem:[#allocation8] sm:$0xff]  ;;  %v851_v48 = vpop.f32.mrf.mxu1 }
 0x131   :  { %2250 = vmatpush3.msra.mxu1 %v970_v45 }
 0x132   :  { %2251 = vmatprep.subr.mxu1 %v969_v46 }
 0x133   :  { %2173 = vmatmul.mubr.msk.f32.gmra.mxu0 %vm538_vm3, %v3005_v51  ;;  %2252 = vmatpush3.msra.mxu1 %v969_v46 }
 0x134   :  { %2175 = vmatprep.mubr.msk.f32.mxu0 %vm538_vm3, %v3011_v55 }
 0x137   :  { %2176 = vmatmul.mubr.msk.f32.gmra.mxu0 %vm538_vm3, %v3017_v59 }
 0x138   :  { %2178 = vmatprep.mubr.msk.f32.mxu0 %vm538_vm3, %v3023_v63 }
 0x13b   :  { %2179 = vmatmul.mubr.msk.f32.gmra.mxu0 %vm538_vm3, %v1844_v5 }
 0x13c   :  { %2181 = vmatprep.mubr.msk.f32.mxu0 %vm538_vm3, %v1845_v9 }
 0x13f   :  { %2182 = vmatmul.mubr.msk.f32.gmra.mxu0 %vm538_vm3, %v1846_v12 }
 0x140   :  { %2184 = vmatprep.mubr.msk.f32.mxu0 %vm538_vm3, %v1847_v16 }
 0x143   :  { %2185 = vmatmul.mubr.msk.f32.gmra.mxu0 %vm538_vm3, %v1848_v20 }
 0x144   :  { %2187 = vmatprep.mubr.msk.f32.mxu0 %vm538_vm3, %v1849_v25 }
 0x147   :  { %2188 = vmatmul.mubr.msk.f32.gmra.mxu0 %vm538_vm3, %v1850_v30 }
 0x148   :  { %2190 = vmatprep.mubr.msk.f32.mxu0 %vm538_vm3, %v1851_v34 }
 0x14b   :  { %2191 = vmatmul.mubr.msk.f32.gmra.mxu0 %vm538_vm3, %v1852_v39 }
 0x15a   :  { %v2202_v49 = vpop.f32.mrf.mxu1 }
 0x15c   :  { %v861_v50 = vpop.f32.mrf.mxu1 }
 0x15e   :  { %v2205_v51 = vpop.f32.mrf.mxu1 }
 0x160   :  { %v871_v52 = vpop.f32.mrf.mxu1 }
 0x162   :  { %v2208_v53 = vpop.f32.mrf.mxu1 }
 0x164   :  { %v881_v54 = vpop.f32.mrf.mxu1 }
 0x166   :  { %v2211_v59 = vpop.f32.mrf.mxu1 }
 0x168   :  { %v891_v3 = vpop.f32.mrf.mxu1 }
 0x16a   :  { %v2214_v11 = vpop.f32.mrf.mxu1 }
 0x16c   :  { %v901_v20 = vpop.f32.mrf.mxu1 }
 0x16e   :  { %v2217_v31 = vpop.f32.mrf.mxu1 }
 0x170   :  { %v911_v41 = vpop.f32.mrf.mxu1 }
 0x1ef   :  { %v2171_v55 = vpop.f32.mrf.mxu0 }
 0x1f0   :  { %v857_v56 = vadd.f32 %v2199_v47, %v2171_v55 }
 0x1f1   :  { %v653_v58 = vpop.f32.mrf.mxu0 }
 0x1f2   :  { %v852_v60 = vadd.f32 %v851_v48, %v653_v58  ;;  %v938_v61 = vadd.f32 %v3085_v57, %v857_v56  ;;  %v2220_v48 = vpop.f32.mrf.mxu1 }
 0x1f3   :  { %v2174_v62 = vpop.f32.mrf.mxu0 }
 0x1f4   :  { %v937_v63 = vadd.f32 %v3085_v57, %v852_v60  ;;  %v867_v0 = vadd.f32 %v2202_v49, %v2174_v62  ;;  %v954_v6 = vmax.f32 %v938_v61, 0.0  ;;  %v921_v56 = vpop.f32.mrf.mxu1 }
 0x1f5   :  { %v663_v2 = vpop.f32.mrf.mxu0 }
 0x1f6   :  { %v953_v4 = vmax.f32 %v937_v63, 0.0  ;;  %v862_v5 = vadd.f32 %v861_v50, %v663_v2  ;;  %v940_v7 = vadd.f32 %v3085_v57, %v867_v0 }
 0x1f7   :  { %v2177_v8 = vpop.f32.mrf.mxu0 }
 0x1f8   :  { %v939_v9 = vadd.f32 %v3085_v57, %v862_v5  ;;  %v877_v1 = vadd.f32 %v2205_v51, %v2177_v8  ;;  %2253 = vmatprep.mubr.f32.mxu1 %v953_v4  ;;  %v956_v14 = vmax.f32 %v940_v7, 0.0 }
 0x1f9   :  { %v673_v10 = vpop.f32.mrf.mxu0  ;;  %2254 = vmatmul.mubr.f32.vlgmr.msra.gmra.mxu1 %v954_v6 }
 0x1fa   :  { %v955_v12 = vmax.f32 %v939_v9, 0.0  ;;  %v872_v13 = vadd.f32 %v871_v52, %v673_v10  ;;  %v942_v15 = vadd.f32 %v3085_v57, %v877_v1 }
 0x1fb   :  { %v2180_v16 = vpop.f32.mrf.mxu0 }
 0x1fc   :  { %v941_v17 = vadd.f32 %v3085_v57, %v872_v13  ;;  %v887_v18 = vadd.f32 %v2208_v53, %v2180_v16  ;;  %2256 = vmatprep.mubr.f32.mxu1 %v955_v12  ;;  %v958_v24 = vmax.f32 %v942_v15, 0.0  ;;  %v1887_v15 = vld [vmem:[%s3285_s9] ss:$0 sm:$0xff] }
 0x1fd   :  { %v683_v19 = vpop.f32.mrf.mxu0  ;;  %2257 = vmatmul.mubr.f32.gmra.mxu1 %v956_v14 }
 0x1fe   :  { %v957_v21 = vmax.f32 %v941_v17, 0.0  ;;  %v882_v22 = vadd.f32 %v881_v54, %v683_v19  ;;  %v944_v25 = vadd.f32 %v3085_v57, %v887_v18 }
 0x1ff   :  { %v2183_v26 = vpop.f32.mrf.mxu0 }
 0x200   :  { %v943_v27 = vadd.f32 %v3085_v57, %v882_v22  ;;  %v897_v29 = vadd.f32 %v2211_v59, %v2183_v26  ;;  %2259 = vmatprep.mubr.f32.mxu1 %v957_v21  ;;  %v960_v34 = vmax.f32 %v944_v25, 0.0 }
 0x201   :  { %v693_v30 = vpop.f32.mrf.mxu0  ;;  %2260 = vmatmul.mubr.f32.gmra.mxu1 %v958_v24  ;;  %v1888_v24 = vld [vmem:[%s3286_s10] ss:$0 sm:$0xff] }
 0x202   :  { %v959_v32 = vmax.f32 %v943_v27, 0.0  ;;  %v892_v33 = vadd.f32 %v891_v3, %v693_v30  ;;  %v946_v35 = vadd.f32 %v3085_v57, %v897_v29 }
 0x203   :  { %v2186_v36 = vpop.f32.mrf.mxu0 }
 0x204   :  { %v945_v38 = vadd.f32 %v3085_v57, %v892_v33  ;;  %v907_v39 = vadd.f32 %v2214_v11, %v2186_v36  ;;  %2262 = vmatprep.mubr.f32.mxu1 %v959_v32  ;;  %v962_v28 = vmax.f32 %v946_v35, 0.0 }
 0x205   :  { %v703_v40 = vpop.f32.mrf.mxu0  ;;  %2263 = vmatmul.mubr.f32.gmra.mxu1 %v960_v34 }
 0x206   :  { %v961_v42 = vmax.f32 %v945_v38, 0.0  ;;  %v902_v43 = vadd.f32 %v901_v20, %v703_v40  ;;  %v948_v37 = vadd.f32 %v3085_v57, %v907_v39 }
 0x207   :  { %v2189_v44 = vpop.f32.mrf.mxu0 }
 0x208   :  { %v947_v45 = vadd.f32 %v3085_v57, %v902_v43  ;;  %v917_v46 = vadd.f32 %v2217_v31, %v2189_v44  ;;  %2265 = vmatprep.mubr.f32.mxu1 %v961_v42  ;;  %v964_v51 = vmax.f32 %v948_v37, 0.0 }
 0x209   :  { %v713_v47 = vpop.f32.mrf.mxu0  ;;  %2266 = vmatmul.mubr.f32.gmra.mxu1 %v962_v28 }
 0x20a   :  { %v963_v49 = vmax.f32 %v947_v45, 0.0  ;;  %v912_v50 = vadd.f32 %v911_v41, %v713_v47  ;;  %v950_v52 = vadd.f32 %v3085_v57, %v917_v46 }
 0x20b   :  { %v2192_v53 = vpop.f32.mrf.mxu0 }
 0x20c   :  { %v949_v54 = vadd.f32 %v3085_v57, %v912_v50  ;;  %v927_v55 = vadd.f32 %v2220_v48, %v2192_v53  ;;  %2268 = vmatprep.mubr.f32.mxu1 %v963_v49  ;;  %v966_v61 = vmax.f32 %v950_v52, 0.0 }
 0x20d   :  { %v723_v58 = vpop.f32.mrf.mxu0  ;;  %2269 = vmatmul.mubr.f32.gmra.mxu1 %v964_v51 }
 0x20e   :  { %v965_v59 = vmax.f32 %v949_v54, 0.0  ;;  %v922_v60 = vadd.f32 %v921_v56, %v723_v58  ;;  %v952_v62 = vadd.f32 %v3085_v57, %v927_v55 }
 0x210   :  { %v951_v63 = vadd.f32 %v3085_v57, %v922_v60  ;;  %2271 = vmatprep.mubr.f32.mxu1 %v965_v59  ;;  %v968_v2 = vmax.f32 %v952_v62, 0.0 }
 0x211   :  { %2272 = vmatmul.mubr.f32.gmra.mxu1 %v966_v61 }
 0x212   :  { %v967_v0 = vmax.f32 %v951_v63, 0.0 }
 0x214   :  { %2274 = vmatprep.mubr.f32.mxu1 %v967_v0 }
 0x215   :  { %2275 = vmatmul.mubr.f32.gmra.mxu1 %v968_v2 }
 0x2b9   :  { %v3103_v3 = vpop.f32.mrf.mxu1 }
 0x2ba   :  { %v3177_v60 = vadd.f32 %v3103_v3, %v1887_v15 }
 0x2bb   :  { %v1058_v4 = vpop.f32.mrf.mxu1 }
 0x2bc   :  { %v3171_v56 = vadd.f32 %v1887_v15, %v1058_v4  ;;  %v1138_v2 = vmax.f32 %v3177_v60, 0.0  ;;  %v1532_v60 = vld [vmem:[#allocation10 + $0x48] sm:$0xff] }
 0x2bd   :  { %v2258_v5 = vpop.f32.mrf.mxu1 }
 0x2be   :  { %v3166_v53 = vadd.f32 %v2258_v5, %v1887_v15  ;;  %v1137_v63 = vmax.f32 %v3171_v56, 0.0  ;;  %v1161_v5 = vmul.f32 %v1888_v24, %v1138_v2  ;;  %v1534_v56 = vld [vmem:[#allocation10 + $0x58] sm:$0xff] }
 0x2bf   :  { %v1068_v6 = vpop.f32.mrf.mxu1 }
 0x2c0   :  { %v3161_v50 = vadd.f32 %v1887_v15, %v1068_v6  ;;  %v1140_v61 = vmax.f32 %v3166_v53, 0.0  ;;  %v1160_v3 = vmul.f32 %v1888_v24, %v1137_v63  ;;  %v3192_v6 = vld [vmem:[#allocation4] ss:$0 sm:$0xff]  ;;  %v1537_v53 = vld [vmem:[#allocation10 + $0x70] sm:$0xff] }
 0x2c1   :  { %v2261_v7 = vpop.f32.mrf.mxu1 }
 0x2c2   :  { %v3156_v47 = vadd.f32 %v2261_v7, %v1887_v15  ;;  %v1139_v58 = vmax.f32 %v3161_v50, 0.0  ;;  %v1163_v4 = vmul.f32 %v1888_v24, %v1140_v61  ;;  %v1536_v50 = vld [vmem:[#allocation10 + $0x68] sm:$0xff] }
 0x2c3   :  { %v1078_v8 = vpop.f32.mrf.mxu1 }
 0x2c4   :  { %v3151_v44 = vadd.f32 %v1887_v15, %v1078_v8  ;;  %v1142_v54 = vmax.f32 %v3156_v47, 0.0  ;;  %v1162_v0 = vmul.f32 %v1888_v24, %v1139_v58 }
 0x2c5   :  { %v2264_v9 = vpop.f32.mrf.mxu1 }
 0x2c6   :  { %v3146_v43 = vadd.f32 %v2264_v9, %v1887_v15  ;;  %v1141_v51 = vmax.f32 %v3151_v44, 0.0  ;;  %v1165_v62 = vmul.f32 %v1888_v24, %v1142_v54 }
 0x2c7   :  { %v1088_v1 = vpop.f32.mrf.mxu1 }
 0x2c8   :  { %v3141_v40 = vadd.f32 %v1887_v15, %v1088_v1  ;;  %v1144_v48 = vmax.f32 %v3146_v43, 0.0  ;;  %v1164_v59 = vmul.f32 %v1888_v24, %v1141_v51 }
 0x2c9   :  { %v2267_v10 = vpop.f32.mrf.mxu1 }
 0x2ca   :  { %v3136_v36 = vadd.f32 %v2267_v10, %v1887_v15  ;;  %v1143_v45 = vmax.f32 %v3141_v40, 0.0  ;;  %v1167_v55 = vmul.f32 %v1888_v24, %v1144_v48 }
 0x2cb   :  { %v1098_v11 = vpop.f32.mrf.mxu1 }
 0x2cc   :  { %v3131_v33 = vadd.f32 %v1887_v15, %v1098_v11  ;;  %v1146_v28 = vmax.f32 %v3136_v36, 0.0  ;;  %v1166_v52 = vmul.f32 %v1888_v24, %v1143_v45 }
 0x2cd   :  { %v2270_v12 = vpop.f32.mrf.mxu1 }
 0x2ce   :  { %v3126_v30 = vadd.f32 %v2270_v12, %v1887_v15  ;;  %v1145_v41 = vmax.f32 %v3131_v33, 0.0  ;;  %v1169_v49 = vmul.f32 %v1888_v24, %v1146_v28 }
 0x2cf   :  { %v1108_v13 = vpop.f32.mrf.mxu1 }
 0x2d0   :  { %v3120_v25 = vadd.f32 %v1887_v15, %v1108_v13  ;;  %v1148_v38 = vmax.f32 %v3126_v30, 0.0  ;;  %v1168_v46 = vmul.f32 %v1888_v24, %v1145_v41 }
 0x2d1   :  { %v2273_v57 = vpop.f32.mrf.mxu1 }
 0x2d2   :  { %v3112_v20 = vadd.f32 %v2273_v57, %v1887_v15  ;;  %v1147_v34 = vmax.f32 %v3120_v25, 0.0  ;;  %v1171_v37 = vmul.f32 %v1888_v24, %v1148_v38 }
 0x2d3   :  { %v1118_v14 = vpop.f32.mrf.mxu1 }
 0x2d4   :  { %v3108_v17 = vadd.f32 %v1887_v15, %v1118_v14  ;;  %v1150_v31 = vmax.f32 %v3112_v20, 0.0  ;;  %v1170_v42 = vmul.f32 %v1888_v24, %v1147_v34 }
 0x2d5   :  { %v2276_v16 = vpop.f32.mrf.mxu1 }
 0x2d6   :  { %v3110_v18 = vadd.f32 %v2276_v16, %v1887_v15  ;;  %v1149_v26 = vmax.f32 %v3108_v17, 0.0  ;;  %v1173_v39 = vmul.f32 %v1888_v24, %v1150_v31 }
 0x2d7   :  { %v1128_v19 = vpop.f32.mrf.mxu1 }
 0x2d8   :  { %v1152_v21 = vmax.f32 %v3110_v18, 0.0  ;;  %v3115_v22 = vadd.f32 %v1887_v15, %v1128_v19  ;;  %v1172_v35 = vmul.f32 %v1888_v24, %v1149_v26 }
 0x2da   :  { %v1151_v27 = vmax.f32 %v3115_v22, 0.0  ;;  %v1175_v29 = vmul.f32 %v1888_v24, %v1152_v21 }
 0x2dc   :  { %1206 = vadd.xlane.f32.xlu1 %v1175_v29  ;;  %v1174_v32 = vmul.f32 %v1888_v24, %v1151_v27 }
 0x2de   :  { %1204 = vadd.xlane.f32.xlu0 %v1174_v32 }
 0x2e0   :  { %1200 = vadd.xlane.f32.xlu1 %v1172_v35 }
 0x2e2   :  { %1202 = vadd.xlane.f32.xlu0 %v1173_v39 }
 0x2e4   :  { %1196 = vadd.xlane.f32.xlu1 %v1170_v42 }
 0x2e6   :  { %1198 = vadd.xlane.f32.xlu0 %v1171_v37 }
 0x2e8   :  { %1192 = vadd.xlane.f32.xlu1 %v1168_v46 }
 0x2ea   :  { %1194 = vadd.xlane.f32.xlu0 %v1169_v49 }
 0x2ec   :  { %1188 = vadd.xlane.f32.xlu1 %v1166_v52 }
 0x2ee   :  { %1190 = vadd.xlane.f32.xlu0 %v1167_v55 }
 0x2f0   :  { %1184 = vadd.xlane.f32.xlu1 %v1164_v59 }
 0x2f2   :  { %1186 = vadd.xlane.f32.xlu0 %v1165_v62 }
 0x2f4   :  { %1180 = vadd.xlane.f32.xlu1 %v1162_v0 }
 0x2f6   :  { %1182 = vadd.xlane.f32.xlu0 %v1163_v4 }
 0x2f8   :  { %1176 = vadd.xlane.f32.xlu1 %v1160_v3 }
 0x2fa   :  { %1178 = vadd.xlane.f32.xlu0 %v1161_v5 }
 0x365   :  { %v1207_v7 = vpop.xlane.xlu1 %1206 }
 0x366   :  { %v1230_v8 = vadd.f32 %v3192_v6, %v1207_v7 }
 0x367   :  { %v1205_v9 = vpop.xlane.xlu0 %1204 }
 0x368   :  { %v1905_v1 = vmul.f32 -1.442695, %v1230_v8  ;;  %v1229_v15 = vadd.f32 %v3192_v6, %v1205_v9 }
 0x369   :  { %v1201_v10 = vpop.xlane.xlu1 %1200 }
 0x36a   :  { %2435 = vpow2.f32 %v1905_v1  ;;  %v1227_v11 = vadd.f32 %v3192_v6, %v1201_v10  ;;  %v1904_v35 = vmul.f32 -1.442695, %v1229_v15 }
 0x36b   :  { %v1203_v12 = vpop.xlane.xlu0 %1202 }
 0x36c   :  { %v1902_v13 = vmul.f32 -1.442695, %v1227_v11  ;;  %v1228_v57 = vadd.f32 %v3192_v6, %v1203_v12 }
 0x36d   :  { %v1197_v14 = vpop.xlane.xlu1 %1196 }
 0x36e   :  { %v1903_v16 = vmul.f32 -1.442695, %v1228_v57  ;;  %2437 = vpow2.f32 %v1902_v13  ;;  %v1225_v29 = vadd.f32 %v3192_v6, %v1197_v14 }
 0x36f   :  { %v1199_v19 = vpop.xlane.xlu0 %1198 }
 0x370   :  { %2439 = vpow2.f32 %v1903_v16  ;;  %v1226_v24 = vadd.f32 %v3192_v6, %v1199_v19  ;;  %v1900_v37 = vmul.f32 -1.442695, %v1225_v29 }
 0x371   :  { %v1193_v32 = vpop.xlane.xlu1 %1192 }
 0x372   :  { %v1901_v39 = vmul.f32 -1.442695, %v1226_v24  ;;  %v1223_v4 = vadd.f32 %v3192_v6, %v1193_v32 }
 0x373   :  { %v1195_v42 = vpop.xlane.xlu0 %1194 }
 0x374   :  { %2441 = vpow2.f32 %v1901_v39  ;;  %v1224_v49 = vadd.f32 %v3192_v6, %v1195_v42  ;;  %v1898_v10 = vmul.f32 -1.442695, %v1223_v4 }
 0x375   :  { %v1189_v46 = vpop.xlane.xlu1 %1188  ;;  %2443 = vpow2.f32 %v1904_v35 }
 0x376   :  { %v1221_v52 = vadd.f32 %v3192_v6, %v1189_v46  ;;  %2445 = vpow2.f32 %v1900_v37  ;;  %v1899_v5 = vmul.f32 -1.442695, %v1224_v49 }
 0x377   :  { %v2436_v55 = vpop.eup %2435  ;;  %v1191_v59 = vpop.xlane.xlu0 %1190 }
 0x378   :  { %v1294_v62 = vadd.f32 1.0, %v2436_v55  ;;  %v1896_v0 = vmul.f32 -1.442695, %v1221_v52  ;;  %v1222_v57 = vadd.f32 %v3192_v6, %v1191_v59 }
 0x379   :  { %v1185_v3 = vpop.xlane.xlu1 %1184 }
 0x37a   :  { %2447 = vrcp.f32 %v1294_v62  ;;  %v1219_v7 = vadd.f32 %v3192_v6, %v1185_v3  ;;  %v1897_v29 = vmul.f32 -1.442695, %v1222_v57 }
 0x37b   :  { %2449 = vpow2.f32 %v1896_v0  ;;  %v2438_v8 = vpop.eup %2437  ;;  %v1187_v11 = vpop.xlane.xlu0 %1186 }
 0x37c   :  { %v1894_v9 = vmul.f32 -1.442695, %v1219_v7  ;;  %2451 = vpow2.f32 %v1899_v5  ;;  %v1291_v15 = vadd.f32 1.0, %v2438_v8  ;;  %v1220_v37 = vadd.f32 %v3192_v6, %v1187_v11 }
 0x37d   :  { %v2440_v1 = vpop.eup %2439  ;;  %v1181_v12 = vpop.xlane.xlu1 %1180 }
 0x37e   :  { %v1292_v13 = vadd.f32 1.0, %v2440_v1  ;;  %v1217_v14 = vadd.f32 %v3192_v6, %v1181_v12  ;;  %2453 = vpow2.f32 %v1894_v9  ;;  %v1895_v62 = vmul.f32 -1.442695, %v1220_v37 }
 0x37f   :  { %v1183_v39 = vpop.xlane.xlu0 %1182 }
 0x380   :  { %2455 = vrcp.f32 %v1292_v13  ;;  %v1892_v16 = vmul.f32 -1.442695, %v1217_v14  ;;  %v1218_v0 = vadd.f32 %v3192_v6, %v1183_v39 }
 0x381   :  { %v2442_v19 = vpop.eup %2441  ;;  %v1177_v24 = vpop.xlane.xlu1 %1176  ;;  %2457 = vpow2.f32 %v1898_v10 }
 0x382   :  { %v1215_v32 = vadd.f32 %v3192_v6, %v1177_v24  ;;  %v2444_v35 = vpop.eup %2443  ;;  %2459 = vpow2.f32 %v1892_v16  ;;  %v1290_v42 = vadd.f32 1.0, %v2442_v19  ;;  %v1893_v9 = vmul.f32 -1.442695, %v1218_v0 }
 0x383   :  { %2461 = vrcp.f32 %v1291_v15  ;;  %v2446_v49 = vpop.eup %2445  ;;  %v1293_v52 = vadd.f32 1.0, %v2444_v35  ;;  %v1179_v3 = vpop.xlane.xlu0 %1178 }
 0x384   :  { %v1890_v46 = vmul.f32 -1.442695, %v1215_v32  ;;  %2463 = vpow2.f32 %v1897_v29  ;;  %v1289_v5 = vadd.f32 1.0, %v2446_v49  ;;  %v1216_v1 = vadd.f32 %v3192_v6, %v1179_v3 }
 0x386   :  { %2465 = vpow2.f32 %v1890_v46  ;;  %v1891_v14 = vmul.f32 -1.442695, %v1216_v1 }
 0x387   :  { %v2448_v55 = vpop.eup %2447  ;;  %2467 = vrcp.f32 %v1290_v42 }
 0x388   :  { %v2450_v59 = vpop.eup %2449  ;;  %1404 = vperm.xlu0 %2434, %v2448_v55   ;;  %2469 = vrcp.f32 %v1293_v52 }
 0x389   :  { %v1285_v4 = vadd.f32 1.0, %v2450_v59  ;;  %v2452_v7 = vpop.eup %2451 }
 0x38a   :  { %v1288_v12 = vadd.f32 1.0, %v2452_v7 }
 0x38b   :  { %2471 = vrcp.f32 %v1285_v4  ;;  %v2454_v8 = vpop.eup %2453 }
 0x38c   :  { %2473 = vpow2.f32 %v1895_v62  ;;  %v1283_v11 = vadd.f32 1.0, %v2454_v8 }
 0x38d   :  { %v2456_v10 = vpop.eup %2455  ;;  %2475 = vrcp.f32 %v1289_v5 }
 0x38e   :  { %1394 = vperm.xlu1 %2433, %v2456_v10   ;;  %v2458_v13 = vpop.eup %2457  ;;  %2477 = vrcp.f32 %v1283_v11  ;;  %v1425_v10 = vshrl.u32 %v337_v23, 7  ;;  %v1554_v23 = vld [vmem:[#allocation11 + $0x68] sm:$0xff] }
 0x38f   :  { %v2460_v57 = vpop.eup %2459  ;;  %2479 = vpow2.f32 %v1893_v9  ;;  %v1287_v29 = vadd.f32 1.0, %v2458_v13 }
 0x390   :  { %v2462_v15 = vpop.eup %2461  ;;  %v1281_v16 = vadd.f32 1.0, %v2460_v57  ;;  %2481 = vrcp.f32 %v1288_v12  ;;  %v3214_v12 = vld [vmem:[%s3278_s2] ss:$0 sm:$0xff]  ;;  %v3216_v13 = vadd.s32 8, %v1425_v10  ;;  %v2637_v57 = vmov 1.0  }
 0x391   :  { %v2464_v19 = vpop.eup %2463  ;;  %vm1431_vm2 = vcmp.eq.s32.totalorder %v3214_v12, %v1425_v10  ;;  %v1526_v10 = vld [vmem:[#allocation10 + $0x18] sm:$0xff] }
 0x392   :  { %1389 = vperm.xlu1 %2433, %v2462_v15   ;;  %2483 = vrcp.f32 %v1281_v16  ;;  %v1286_v42 = vadd.f32 1.0, %v2464_v19  ;;  %vm1432_vm3 = vcmp.eq.s32.totalorder %v3214_v12, %v3216_v13  ;;  %2309 = vmatprep.mubr.msk.f32.mxu0 %vm1431_vm2, %v2637_v57  ;;  %v1555_v15 = vld [vmem:[#allocation11 + $0x70] sm:$0xff]  ;;  %v1553_v16 = vld [vmem:[#allocation11 + $0x60] sm:$0xff]  ;;  %v1552_v19 = vld [vmem:[#allocation11 + $0x58] sm:$0xff] }
 0x393   :  { %v2466_v24 = vpop.eup %2465  ;;  %2485 = vpow2.f32 %v1891_v14  ;;  %v1556_v14 = vld [vmem:[#allocation11 + $0x78] sm:$0xff]  ;;  %v1524_v12 = vld [vmem:[#allocation10 + $0x8] sm:$0xff]  ;;  %v1541_v13 = vld [vmem:[#allocation11] sm:$0xff] }
 0x394   :  { %v2468_v6 = vpop.eup %2467  ;;  %v1279_v32 = vadd.f32 1.0, %v2466_v24  ;;  %2312 = vmatprep.subr.mxu1 %v1556_v14  ;;  %v1551_v24 = vld [vmem:[#allocation11 + $0x50] sm:$0xff] }
 0x395   :  { %v2470_v35 = vpop.eup %2469  ;;  %2313 = vmatpush3.msra.mxu1 %v1556_v14  ;;  %v1523_v14 = vld [vmem:[#allocation10] sm:$0xff] }
 0x396   :  { %1384 = vperm.xlu1 %2433, %v2468_v6   ;;  %2487 = vrcp.f32 %v1279_v32  ;;  %2314 = vmatprep.subr.mxu1 %v1555_v15  ;;  %v1549_v6 = vld [vmem:[#allocation11 + $0x40] sm:$0xff]  ;;  %v1548_v32 = vld [vmem:[#allocation11 + $0x38] sm:$0xff] }
 0x397   :  { %2489 = vrcp.f32 %v1287_v29  ;;  %2315 = vmatpush3.msra.mxu1 %v1555_v15  ;;  %v1550_v29 = vld [vmem:[#allocation11 + $0x48] sm:$0xff]  ;;  %v1540_v15 = vld [vmem:[%s3279_s3 + $0x8] sm:$0xff] }
 0x398   :  { %v2472_v39 = vpop.eup %2471  ;;  %2491 = vrcp.f32 %v1286_v42  ;;  %2316 = vmatprep.subr.mxu1 %v1554_v23  ;;  %v1545_v42 = vld [vmem:[#allocation11 + $0x20] sm:$0xff] }
 0x399   :  { %v2474_v37 = vpop.eup %2473  ;;  %1359 = vperm.xlu0 %2434, %v2472_v39   ;;  %2317 = vmatpush3.msra.mxu1 %v1554_v23  ;;  %v1546_v39 = vld [vmem:[#allocation11 + $0x28] sm:$0xff]  ;;  %v1733_v23 = vld [vmem:[#allocation13 + $0x78] sm:$0xff] }
 0x39a   :  { %1399 = vperm.xlu1 %2433, %v2470_v35   ;;  %v2476_v46 = vpop.eup %2475  ;;  %v1284_v52 = vadd.f32 1.0, %v2474_v37  ;;  %2318 = vmatprep.subr.mxu1 %v1553_v16  ;;  %v1547_v35 = vld [vmem:[#allocation11 + $0x30] sm:$0xff]  ;;  %v1544_v37 = vld [vmem:[#allocation11 + $0x18] sm:$0xff] }
 0x39b   :  { %v2478_v49 = vpop.eup %2477  ;;  %2319 = vmatpush3.msra.mxu1 %v1553_v16  ;;  %v1732_v16 = vld [vmem:[#allocation13 + $0x70] sm:$0xff] }
 0x39c   :  { %v2480_v55 = vpop.eup %2479  ;;  %2493 = vrcp.f32 %v1284_v52  ;;  %2320 = vmatprep.subr.mxu1 %v1552_v19 }
 0x39d   :  { %1349 = vperm.xlu0 %2434, %v2478_v49   ;;  %v2482_v59 = vpop.eup %2481  ;;  %v1282_v0 = vadd.f32 1.0, %v2480_v55  ;;  %2321 = vmatpush3.msra.mxu1 %v1552_v19  ;;  %v1542_v49 = vld [vmem:[#allocation11 + $0x8] sm:$0xff] }
 0x39e   :  { %1379 = vperm.xlu1 %2433, %v2476_v46   ;;  %2322 = vmatprep.subr.mxu1 %v1551_v24  ;;  %v1543_v46 = vld [vmem:[#allocation11 + $0x10] sm:$0xff]  ;;  %v1731_v19 = vld [vmem:[#allocation13 + $0x68] sm:$0xff] }
 0x39f   :  { %v2484_v62 = vpop.eup %2483  ;;  %2495 = vrcp.f32 %v1282_v0  ;;  %2323 = vmatpush3.msra.mxu1 %v1551_v24  ;;  %v1730_v24 = vld [vmem:[#allocation13 + $0x60] sm:$0xff] }
 0x3a0   :  { %v2486_v4 = vpop.eup %2485  ;;  %2324 = vmatprep.subr.mxu1 %v1550_v29 }
 0x3a1   :  { %1339 = vperm.xlu0 %2434, %v2484_v62   ;;  %v1280_v5 = vadd.f32 1.0, %v2486_v4  ;;  %2325 = vmatpush3.msra.mxu1 %v1550_v29  ;;  %v1729_v29 = vld [vmem:[#allocation13 + $0x58] sm:$0xff] }
 0x3a2   :  { %1374 = vperm.xlu1 %2433, %v2482_v59   ;;  %2326 = vmatprep.subr.mxu1 %v1549_v6 }
 0x3a3   :  { %v2488_v3 = vpop.eup %2487  ;;  %2497 = vrcp.f32 %v1280_v5  ;;  %2327 = vmatpush3.msra.mxu1 %v1549_v6  ;;  %v1728_v6 = vld [vmem:[#allocation13 + $0x50] sm:$0xff] }
 0x3a4   :  { %v2490_v7 = vpop.eup %2489  ;;  %2328 = vmatprep.subr.mxu1 %v1548_v32 }
 0x3a5   :  { %1329 = vperm.xlu0 %2434, %v2488_v3   ;;  %v2492_v8 = vpop.eup %2491  ;;  %2329 = vmatpush3.msra.mxu1 %v1548_v32  ;;  %v1727_v32 = vld [vmem:[#allocation13 + $0x48] sm:$0xff] }
 0x3a6   :  { %1369 = vperm.xlu1 %2433, %v2490_v7   ;;  %2330 = vmatprep.subr.mxu1 %v1547_v35 }
 0x3a7   :  { %2331 = vmatpush3.msra.mxu1 %v1547_v35  ;;  %v1726_v35 = vld [vmem:[#allocation13 + $0x40] sm:$0xff] }
 0x3a8   :  { %2332 = vmatprep.subr.mxu1 %v1546_v39 }
 0x3a9   :  { %v2494_v9 = vpop.eup %2493  ;;  %2333 = vmatpush3.msra.mxu1 %v1546_v39  ;;  %v1725_v39 = vld [vmem:[#allocation13 + $0x38] sm:$0xff] }
 0x3aa   :  { %1364 = vperm.xlu1 %2433, %v2492_v8   ;;  %2334 = vmatprep.subr.mxu1 %v1545_v42 }
 0x3ab   :  { %2335 = vmatpush3.msra.mxu1 %v1545_v42  ;;  %v1724_v42 = vld [vmem:[#allocation13 + $0x30] sm:$0xff] }
 0x3ac   :  { %v2496_v1 = vpop.eup %2495  ;;  %2336 = vmatprep.subr.mxu1 %v1544_v37 }
 0x3ad   :  { %2337 = vmatpush3.msra.mxu1 %v1544_v37  ;;  %v1723_v37 = vld [vmem:[#allocation13 + $0x28] sm:$0xff] }
 0x3ae   :  { %1354 = vperm.xlu1 %2433, %v2494_v9   ;;  %2338 = vmatprep.subr.mxu1 %v1543_v46  ;;  %v1528_v9 = vld [vmem:[#allocation10 + $0x28] sm:$0xff] }
 0x3af   :  { %2339 = vmatpush3.msra.mxu1 %v1543_v46 }
 0x3b0   :  { %v2498_v11 = vpop.eup %2497  ;;  %2340 = vmatprep.subr.mxu1 %v1542_v49 }
 0x3b1   :  { %2341 = vmatpush3.msra.mxu1 %v1542_v49 }
 0x3b2   :  { %1344 = vperm.xlu1 %2433, %v2496_v1   ;;  %v1527_v1 = vld [vmem:[#allocation10 + $0x20] sm:$0xff]  ;;  %2342 = vmatprep.subr.mxu1 %v1541_v13 }
 0x3b3   :  { %2343 = vmatpush3.msra.mxu1 %v1541_v13 }
 0x3b4   :  { %2382 = vmatprep.subr.mxu1 %v1733_v23 }
 0x3b6   :  { %1334 = vperm.xlu1 %2433, %v2498_v11   ;;  %v1525_v11 = vld [vmem:[#allocation10 + $0x10] sm:$0xff] }
 0x403   :  { %v1405_v52 = vpop.permute.xlu0 %1404 }
 0x404   :  { %v1422_v55 = vmul.f32 %v1405_v52, %v1152_v21  ;;  %v1722_v52 = vld [vmem:[#allocation13 + $0x20] sm:$0xff] }
 0x406   :  { %2277 = vmatprep.subr.mxu0 %v1422_v55 }
 0x407   :  { %2278 = vmatpush3.msra.mxu0 %v1422_v55  ;;  %v1721_v55 = vld [vmem:[#allocation13 + $0x18] sm:$0xff] }
 0x409   :  { %v1395_v59 = vpop.permute.xlu1 %1394 }
 0x40a   :  { %v1420_v5 = vmul.f32 %v1395_v59, %v1150_v31  ;;  %v1720_v59 = vld [vmem:[#allocation13 + $0x10] sm:$0xff] }
 0x40d   :  { %v1390_v62 = vpop.permute.xlu1 %1389 }
 0x40e   :  { %v1419_v8 = vmul.f32 %v1390_v62, %v1149_v26  ;;  %v1719_v62 = vld [vmem:[#allocation13 + $0x8] sm:$0xff] }
 0x411   :  { %v1385_v0 = vpop.permute.xlu1 %1384 }
 0x412   :  { %v1418_v18 = vmul.f32 %v1385_v0, %v1148_v38  ;;  %v1718_v0 = vld [vmem:[#allocation13] sm:$0xff] }
 0x414   :  { %v1360_v20 = vpop.permute.xlu0 %1359 }
 0x415   :  { %v1400_v4 = vpop.permute.xlu1 %1399 }
 0x416   :  { %v1421_v3 = vmul.f32 %v1400_v4, %v1151_v27 }
 0x418   :  { %2279 = vmatprep.subr.mxu0 %v1421_v3  ;;  %v1350_v30 = vpop.permute.xlu0 %1349 }
 0x419   :  { %v1380_v7 = vpop.permute.xlu1 %1379  ;;  %2280 = vmatpush3.msra.mxu0 %v1421_v3 }
 0x41a   :  { %2281 = vmatprep.subr.mxu0 %v1420_v5  ;;  %v1417_v22 = vmul.f32 %v1380_v7, %v1147_v34  ;;  %v1413_v34 = vmul.f32 %v1360_v20, %v1143_v45  ;;  %v1911_v7 = vld [vmem:[%s3290_s14] ss:$0 sm:$0xff]  ;;  %s2599_s14 = scalar_lea.vmem %s1824_s8, 256 }
 0x41b   :  { %2282 = vmatpush3.msra.mxu0 %v1420_v5  ;;  %p2600_p11 = scmp.ne.s32.totalorder %s1824_s8, %s2599_s14  ;;  %p2605_p13 = scmp.lt.s32.totalorder %s2599_s14, %s2599_s14 }
 0x41c   :  { %2283 = vmatprep.subr.mxu0 %v1419_v8  ;;  %v1340_v33 = vpop.permute.xlu0 %1339 }
 0x41d   :  { %v1375_v21 = vpop.permute.xlu1 %1374  ;;  %2284 = vmatpush3.msra.mxu0 %v1419_v8  ;;  %v1409_v40 = vmul.f32 %v1340_v33, %v1139_v58  ;;  %v1533_v58 = vld [vmem:[#allocation10 + $0x50] sm:$0xff]  ;;  %p2606_p0 = por %p2605_p13, %p2604_p12 }
 0x41e   :  { %2285 = vmatprep.subr.mxu0 %v1418_v18  ;;  %v1416_v27 = vmul.f32 %v1375_v21, %v1146_v28 }
 0x41f   :  { %2286 = vmatpush3.msra.mxu0 %v1418_v18  ;;  %p2607_p1 = pnand %p2606_p0, %p2600_p11 }
 0x420   :  { %2287 = vmatprep.subr.mxu0 %v1417_v22  ;;  %v1330_v45 = vpop.permute.xlu0 %1329 }
 0x421   :  { %v1370_v17 = vpop.permute.xlu1 %1369  ;;  %2288 = vmatpush3.msra.mxu0 %v1417_v22  ;;  %v1407_v44 = vmul.f32 %v1330_v45, %v1137_v63  ;;  %v1530_v63 = vld [vmem:[#allocation10 + $0x38] sm:$0xff] }
 0x422   :  { %v1415_v26 = vmul.f32 %v1370_v17, %v1145_v41  ;;  %2289 = vmatprep.subr.mxu0 %v1416_v27  ;;  %v1411_v41 = vmul.f32 %v1350_v30, %v1141_v51  ;;  %v1538_v51 = vld [vmem:[#allocation10 + $0x78] sm:$0xff] }
 0x423   :  { %2290 = vmatpush3.msra.mxu0 %v1416_v27 }
 0x424   :  { %2291 = vmatprep.subr.mxu0 %v1415_v26 }
 0x425   :  { %v1365_v31 = vpop.permute.xlu1 %1364  ;;  %2292 = vmatpush3.msra.mxu0 %v1415_v26  ;;  %v1912_v26 = vld [vmem:[%s3292_s16] ss:$0 sm:$0xff] }
 0x426   :  { %v1414_v25 = vmul.f32 %v1365_v31, %v1144_v48 }
 0x428   :  { %2293 = vmatprep.subr.mxu0 %v1414_v25 }
 0x429   :  { %v1355_v36 = vpop.permute.xlu1 %1354  ;;  %2294 = vmatpush3.msra.mxu0 %v1414_v25 }
 0x42a   :  { %v1412_v38 = vmul.f32 %v1355_v36, %v1142_v54  ;;  %2295 = vmatprep.subr.mxu0 %v1413_v34  ;;  %v1535_v54 = vld [vmem:[#allocation10 + $0x60] sm:$0xff] }
 0x42b   :  { %2296 = vmatpush3.msra.mxu0 %v1413_v34 }
 0x42c   :  { %2297 = vmatprep.subr.mxu0 %v1412_v38 }
 0x42d   :  { %v1345_v28 = vpop.permute.xlu1 %1344  ;;  %2298 = vmatpush3.msra.mxu0 %v1412_v38 }
 0x42e   :  { %v1410_v43 = vmul.f32 %v1345_v28, %v1140_v61  ;;  %2299 = vmatprep.subr.mxu0 %v1411_v41  ;;  %v1531_v61 = vld [vmem:[#allocation10 + $0x40] sm:$0xff] }
 0x42f   :  { %2300 = vmatpush3.msra.mxu0 %v1411_v41 }
 0x430   :  { %2301 = vmatprep.subr.mxu0 %v1410_v43 }
 0x431   :  { %v1335_v47 = vpop.permute.xlu1 %1334  ;;  %2302 = vmatpush3.msra.mxu0 %v1410_v43 }
 0x432   :  { %v1408_v48 = vmul.f32 %v1335_v47, %v1138_v2  ;;  %2303 = vmatprep.subr.mxu0 %v1409_v40  ;;  %v1529_v2 = vld [vmem:[#allocation10 + $0x30] sm:$0xff] }
 0x433   :  { %2304 = vmatpush3.msra.mxu0 %v1409_v40 }
 0x434   :  { %2305 = vmatprep.subr.mxu0 %v1408_v48 }
 0x435   :  { %2306 = vmatpush3.msra.mxu0 %v1408_v48 }
 0x436   :  { %2307 = vmatprep.subr.mxu0 %v1407_v44 }
 0x437   :  { %2308 = vmatpush3.msra.mxu0 %v1407_v44 }
 0x438   :  { %2310 = vmatmul.mubr.msk.f32.vlgmr.msra.gmra.mxu0 %vm1432_vm3, %v2637_v57  ;;  %2347 = vmatprep.subr.mxu0 %v1538_v51  ;;  %v1539_v57 = vld [vmem:[%s3279_s3] sm:$0xff] }
 0x439   :  { %2348 = vmatpush3.msra.mxu0 %v1538_v51  ;;  %2344 = vmatprep.mubr.f32.mxu1 %v1539_v57 }
 0x43a   :  { %2349 = vmatprep.subr.mxu0 %v1537_v53  ;;  %2345 = vmatmul.mubr.f32.vlgmr.msra.gmra.mxu1 %v1540_v15 }
 0x43b   :  { %2350 = vmatpush3.msra.mxu0 %v1537_v53  ;;  %2383 = vmatpush3.msra.mxu1 %v1733_v23 }
 0x43c   :  { %2351 = vmatprep.subr.mxu0 %v1536_v50  ;;  %2384 = vmatprep.subr.mxu1 %v1732_v16 }
 0x43d   :  { %2352 = vmatpush3.msra.mxu0 %v1536_v50  ;;  %2385 = vmatpush3.msra.mxu1 %v1732_v16 }
 0x43e   :  { %2353 = vmatprep.subr.mxu0 %v1535_v54  ;;  %2386 = vmatprep.subr.mxu1 %v1731_v19 }
 0x43f   :  { %2354 = vmatpush3.msra.mxu0 %v1535_v54  ;;  %2387 = vmatpush3.msra.mxu1 %v1731_v19 }
 0x440   :  { %2355 = vmatprep.subr.mxu0 %v1534_v56  ;;  %2388 = vmatprep.subr.mxu1 %v1730_v24 }
 0x441   :  { %2356 = vmatpush3.msra.mxu0 %v1534_v56  ;;  %2389 = vmatpush3.msra.mxu1 %v1730_v24 }
 0x442   :  { %2357 = vmatprep.subr.mxu0 %v1533_v58  ;;  %2390 = vmatprep.subr.mxu1 %v1729_v29 }
 0x443   :  { %2358 = vmatpush3.msra.mxu0 %v1533_v58  ;;  %2391 = vmatpush3.msra.mxu1 %v1729_v29 }
 0x444   :  { %2359 = vmatprep.subr.mxu0 %v1532_v60  ;;  %2392 = vmatprep.subr.mxu1 %v1728_v6 }
 0x445   :  { %2360 = vmatpush3.msra.mxu0 %v1532_v60  ;;  %2393 = vmatpush3.msra.mxu1 %v1728_v6 }
 0x446   :  { %2361 = vmatprep.subr.mxu0 %v1531_v61  ;;  %2394 = vmatprep.subr.mxu1 %v1727_v32 }
 0x447   :  { %2362 = vmatpush3.msra.mxu0 %v1531_v61  ;;  %2395 = vmatpush3.msra.mxu1 %v1727_v32 }
 0x448   :  { %2363 = vmatprep.subr.mxu0 %v1530_v63  ;;  %2396 = vmatprep.subr.mxu1 %v1726_v35 }
 0x449   :  { %2364 = vmatpush3.msra.mxu0 %v1530_v63  ;;  %2397 = vmatpush3.msra.mxu1 %v1726_v35 }
 0x44a   :  { %2365 = vmatprep.subr.mxu0 %v1529_v2  ;;  %2398 = vmatprep.subr.mxu1 %v1725_v39 }
 0x44b   :  { %2366 = vmatpush3.msra.mxu0 %v1529_v2  ;;  %2399 = vmatpush3.msra.mxu1 %v1725_v39 }
 0x44c   :  { %2367 = vmatprep.subr.mxu0 %v1528_v9  ;;  %2400 = vmatprep.subr.mxu1 %v1724_v42 }
 0x44d   :  { %2368 = vmatpush3.msra.mxu0 %v1528_v9  ;;  %2401 = vmatpush3.msra.mxu1 %v1724_v42 }
 0x44e   :  { %2369 = vmatprep.subr.mxu0 %v1527_v1  ;;  %2402 = vmatprep.subr.mxu1 %v1723_v37 }
 0x44f   :  { %2370 = vmatpush3.msra.mxu0 %v1527_v1  ;;  %2403 = vmatpush3.msra.mxu1 %v1723_v37 }
 0x450   :  { %2371 = vmatprep.subr.mxu0 %v1526_v10  ;;  %2404 = vmatprep.subr.mxu1 %v1722_v52 }
 0x451   :  { %2372 = vmatpush3.msra.mxu0 %v1526_v10  ;;  %2405 = vmatpush3.msra.mxu1 %v1722_v52 }
 0x452   :  { %2373 = vmatprep.subr.mxu0 %v1525_v11  ;;  %2406 = vmatprep.subr.mxu1 %v1721_v55 }
 0x453   :  { %2374 = vmatpush3.msra.mxu0 %v1525_v11  ;;  %2407 = vmatpush3.msra.mxu1 %v1721_v55 }
 0x454   :  { %2375 = vmatprep.subr.mxu0 %v1524_v12  ;;  %2408 = vmatprep.subr.mxu1 %v1720_v59 }
 0x455   :  { %2376 = vmatpush3.msra.mxu0 %v1524_v12  ;;  %2409 = vmatpush3.msra.mxu1 %v1720_v59 }
 0x456   :  { %2377 = vmatprep.subr.mxu0 %v1523_v14  ;;  %2410 = vmatprep.subr.mxu1 %v1719_v62 }
 0x457   :  { %2378 = vmatpush3.msra.mxu0 %v1523_v14  ;;  %2411 = vmatpush3.msra.mxu1 %v1719_v62 }
 0x458   :  { %2412 = vmatprep.subr.mxu1 %v1718_v0 }
 0x459   :  { %2413 = vmatpush3.msra.mxu1 %v1718_v0 }
 0x4f8   :  { %v2311_v46 = vpop.f32.mrf.mxu0 }
 0x4fa   :  { %v1505_v49 = vpop.f32.mrf.mxu0  ;;  %v2346_v4 = vpop.f32.mrf.mxu1 }
 0x4fb   :  { %2379 = vmatprep.mubr.f32.mxu0 %v1505_v49 }
 0x4fc   :  { %2380 = vmatmul.mubr.f32.vlgmr.msra.gmra.mxu0 %v2311_v46  ;;  %v1623_v8 = vpop.f32.mrf.mxu1 }
 0x5bc   :  { %v2381_v3 = vpop.f32.mrf.mxu0 }
 0x5bd   :  { %v1704_v5 = vadd.f32 %v2381_v3, %v2346_v4 }
 0x5be   :  { %v1698_v18 = vpop.f32.mrf.mxu0 }
 0x5bf   :  { %v1699_v21 = vadd.f32 %v1698_v18, %v1623_v8  ;;  %v1715_v22 = vadd.f32 %v1911_v7, %v1704_v5 }
 0x5c1   :  { %v1714_v20 = vadd.f32 %v1911_v7, %v1699_v21  ;;  %v1717_v17 = vmax.f32 %v1715_v22, 0.0 }
 0x5c3   :  { %v1716_v27 = vmax.f32 %v1714_v20, 0.0 }
 0x5c5   :  { %2414 = vmatprep.mubr.f32.mxu1 %v1716_v27 }
 0x5c6   :  { %2415 = vmatmul.mubr.f32.vlgmr.msra.gmra.mxu1 %v1717_v17 }
 0x686   :  { %v2416_v30 = vpop.f32.mrf.mxu1 }
 0x687   :  { %v1813_v31 = vadd.f32 %v2416_v30, %v1912_v26 }
 0x688   :  { %v1807_v25 = vpop.f32.mrf.mxu1 }
 0x689   :  { %1817 = vst [vmem:[#allocation14 + $0x8] sm:$0xff] %v1813_v31  ;;  %v1808_v34 = vadd.f32 %v1912_v26, %v1807_v25 }
 0x68b   :  { %1816 = vst [vmem:[#allocation14] sm:$0xff] %v1808_v34 }
 0x68c   :  { %2610 = shalt.err (!%p2607_p1)
}
 0x68d   :  { %1829 = dma.vmem_to_hbm [thread:$0]  %s1824_s8, 256, %s3293_s17, [#allocation7], %s2629_s30, %s2629_s30, %s2630_s11  }
 0x68e   :  { %2625 = dma.done.wait [#allocation7], 256  }
 0x68f   :  { %2626 = vsyncadd [#allocation7], 4294967040 }
 0x690   :  { %1833 = vsyncpa [#allocation6], 1 }
 0x691   :  { %1834 = vsyncpa [#allocation9], 1 }
 0x692   :  { %1835 = vsyncpa [#allocation12], 1 }
 0x693   :  { %1836 = vsyncpa [#allocation7], 1 }

</bundles_post_ra>
